<compile_context>
chip_gen: v7x
topology: tpu7x:2x2x1
jax: 0.10.0
libtpu: 0.0.40
codegen_flags: <defaults>
</compile_context>

<pallas_src>
import functools
import math

import numpy as np
import jax
import jax.numpy as jnp
from jax.experimental import pallas as pl
from jax.experimental.pallas import tpu as pltpu

LN_EPS = 1e-12  # reference repo's custom LayerNorm uses eps=1e-12

# Linear tile defaults: safe under v7x's 32 MiB scoped VMEM with double-buffering;
# on v6e (128 MiB VMEM) these can be raised toward tm=512, tn=tk=1024.
LIN_TM, LIN_TN, LIN_TK = 256, 512, 512


# ----------------------------------------------------------------------------
# Tiling helpers
# ----------------------------------------------------------------------------

def _tile(dim, target, quantum):
    """Pick a block size: full dim if small, else a quantum-aligned tile."""
    if dim <= target:
        return dim
    return max((target // quantum) * quantum, quantum)


def _pad_axis(x, axis, multiple):
    size = x.shape[axis]
    pad = (-size) % multiple
    if pad == 0:
        return x
    widths = [(0, 0)] * x.ndim
    widths[axis] = (0, pad)
    return jnp.pad(x, widths)


# ----------------------------------------------------------------------------
# Pallas kernels
# ----------------------------------------------------------------------------

def _linear_kernel(x_ref, w_ref, b_ref, o_ref, acc_ref, *, activation):
    # out = act(x @ w + b); bf16 MXU operands, K-accumulated in f32 VMEM scratch.
    k = pl.program_id(2)

    @pl.when(k == 0)
    def _():
        acc_ref[...] = jnp.zeros_like(acc_ref)

    acc_ref[...] += jnp.dot(x_ref[...], w_ref[...],
                            preferred_element_type=jnp.float32)

    @pl.when(k == pl.num_programs(2) - 1)
    def _():
        y = acc_ref[...] + b_ref[...]
        if activation == "relu":
            y = jnp.maximum(y, 0.0)
        o_ref[...] = y.astype(o_ref.dtype)


def _linear_res_ln_kernel(x_ref, w_ref, b_ref, res_ref, g_ref, be_ref,
                          o_ref, acc_ref, *, eps):
    # out = LayerNorm(x @ w + b + residual) * gamma + beta   (LN over full last dim)
    k = pl.program_id(1)

    @pl.when(k == 0)
    def _():
        acc_ref[...] = jnp.zeros_like(acc_ref)

    acc_ref[...] += jnp.dot(x_ref[...], w_ref[...],
                            preferred_element_type=jnp.float32)

    @pl.when(k == pl.num_programs(1) - 1)
    def _():
        y = acc_ref[...] + b_ref[...] + res_ref[...]          # bf16 residual -> f32
        mean = jnp.mean(y, axis=-1, keepdims=True)
        var = jnp.mean((y - mean) ** 2, axis=-1, keepdims=True)
        o_ref[...] = ((y - mean) * jax.lax.rsqrt(var + eps) * g_ref[...]
                      + be_ref[...]).astype(o_ref.dtype)


def _ffn_ln_kernel(x_ref, w1_ref, b1_ref, w2_ref, b2_ref, g_ref, be_ref,
                   o_ref, acc_ref, *, eps):
    # out = LayerNorm(relu(x @ w1 + b1) @ w2 + b2 + x) * gamma + beta
    # Reduction axis = FFN hidden dim (grid axis 1). x itself is the residual.
    f = pl.program_id(1)

    @pl.when(f == 0)
    def _():
        acc_ref[...] = jnp.zeros_like(acc_ref)

    h = jnp.dot(x_ref[...], w1_ref[...],
                preferred_element_type=jnp.float32) + b1_ref[...]
    h = jnp.maximum(h, 0.0)
    acc_ref[...] += jnp.dot(h.astype(jnp.bfloat16), w2_ref[...],
                            preferred_element_type=jnp.float32)

    @pl.when(f == pl.num_programs(1) - 1)
    def _():
        y = acc_ref[...] + b2_ref[...] + x_ref[...]
        mean = jnp.mean(y, axis=-1, keepdims=True)
        var = jnp.mean((y - mean) ** 2, axis=-1, keepdims=True)
        o_ref[...] = ((y - mean) * jax.lax.rsqrt(var + eps) * g_ref[...]
                      + be_ref[...]).astype(o_ref.dtype)


def _attention_core(q, k, v, keep, n_head):
    """q: [Sq, D] bf16 (already scaled), k/v: [Sk, D] bf16, keep: [Sq, Sk] bool.

    All heads batched into one dot_general (batch dim = head), f32 softmax,
    single lane-dense [Sq, D] result."""
    Sq, D = q.shape
    dh = D // n_head
    qh = jnp.stack([q[:, h * dh:(h + 1) * dh] for h in range(n_head)], axis=0)
    kh = jnp.stack([k[:, h * dh:(h + 1) * dh] for h in range(n_head)], axis=0)
    vh = jnp.stack([v[:, h * dh:(h + 1) * dh] for h in range(n_head)], axis=0)
    # scores: [H, Sq, Sk] in f32
    s = jax.lax.dot_general(qh, kh, (((2,), (2,)), ((0,), (0,))),
                            preferred_element_type=jnp.float32)
    s = jnp.where(keep[None], s, jnp.float32(-10000.0))   # masked_fill(mask==0, -1e4)
    s = s - jnp.max(s, axis=-1, keepdims=True)
    p = jnp.exp(s)
    p = p * pl.reciprocal(jnp.sum(p, axis=-1, keepdims=True), approx=True)
    o = jax.lax.dot_general(p.astype(jnp.bfloat16), vh, (((2,), (1,)), ((0,), (0,))),
                            preferred_element_type=jnp.float32)        # [H, Sq, dh]
    # merge heads back to lane-dense [Sq, D]
    return jnp.concatenate([o[h] for h in range(n_head)], axis=-1)


def _mha_self_kernel(qkv_ref, m_ref, o_ref, *, n_head, scale, d):
    # One batch element, all heads. qkv block: [1, S, 3D] bf16 (fused Q|K|V columns),
    # mask: [1, S, S] bf16 (1 keep / 0 masked).
    x = qkv_ref[0]
    q = x[:, :d] * scale                 # fold 1/sqrt(dh) into q once
    k = x[:, d:2 * d]
    v = x[:, 2 * d:3 * d]
    keep = m_ref[0] > 0                  # compare once per grid step
    o_ref[0] = _attention_core(q, k, v, keep, n_head).astype(o_ref.dtype)


def _mha_cross_kernel(q_ref, kv_ref, m_ref, o_ref, *, n_head, scale, d):
    # q block: [1, St, D] bf16; kv block: [1, Ss, 2D] bf16 (fused K|V columns).
    q = q_ref[0] * scale
    kvx = kv_ref[0]
    k = kvx[:, :d]
    v = kvx[:, d:2 * d]
    keep = m_ref[0] > 0
    o_ref[0] = _attention_core(q, k, v, keep, n_head).astype(o_ref.dtype)


# ----------------------------------------------------------------------------
# Pallas wrappers
# ----------------------------------------------------------------------------

def tiled_linear(x, w, b, activation=None, out_dtype=jnp.bfloat16,
                 tm=LIN_TM, tn=LIN_TN, tk=LIN_TK):
    """x: [M, K] bf16, w: [K, N] bf16, b: [N] f32 -> [M, N] out_dtype (tiled matmul)."""
    M, K = x.shape
    N = w.shape[1]
    tm_ = _tile(M, tm, 8)
    tn_ = _tile(N, tn, 128)
    tk_ = _tile(K, tk, 128)

    xp = _pad_axis(_pad_axis(x, 0, tm_), 1, tk_)
    wp = _pad_axis(_pad_axis(w, 0, tk_), 1, tn_)
    bp = _pad_axis(b.reshape(1, N), 1, tn_)
    Mp, Kp = xp.shape
    Np = wp.shape[1]

    out = pl.pallas_call(
        functools.partial(_linear_kernel, activation=activation),
        out_shape=jax.ShapeDtypeStruct((Mp, Np), out_dtype),
        grid_spec=pltpu.PrefetchScalarGridSpec(
            num_scalar_prefetch=0,
            grid=(Mp // tm_, Np // tn_, Kp // tk_),
            in_specs=[
                pl.BlockSpec((tm_, tk_), lambda i, j, k: (i, k)),
                pl.BlockSpec((tk_, tn_), lambda i, j, k: (k, j)),
                pl.BlockSpec((1, tn_), lambda i, j, k: (0, j)),
            ],
            out_specs=pl.BlockSpec((tm_, tn_), lambda i, j, k: (i, j)),
            scratch_shapes=[pltpu.VMEM((tm_, tn_), jnp.float32)]),
        compiler_params=pltpu.CompilerParams(
            dimension_semantics=("parallel", "parallel", "arbitrary")),
    )(xp, wp, bp)
    return out[:M, :N]


def linear_residual_ln(x, w, b, residual, gamma, beta, tm=LIN_TM, tk=LIN_TK):
    """LayerNorm(x @ w + b + residual) * gamma + beta.  x: [M,K] bf16 -> [M,D] bf16."""
    M, K = x.shape
    D = w.shape[1]
    tm_ = _tile(M, tm, 8)
    tk_ = _tile(K, tk, 128)

    xp = _pad_axis(_pad_axis(x, 0, tm_), 1, tk_)
    wp = _pad_axis(w, 0, tk_)
    rp = _pad_axis(residual, 0, tm_)
    Mp, Kp = xp.shape

    out = pl.pallas_call(
        functools.partial(_linear_res_ln_kernel, eps=LN_EPS),
        out_shape=jax.ShapeDtypeStruct((Mp, D), jnp.bfloat16),
        grid_spec=pltpu.PrefetchScalarGridSpec(
            num_scalar_prefetch=0,
            grid=(Mp // tm_, Kp // tk_),
            in_specs=[
                pl.BlockSpec((tm_, tk_), lambda i, k: (i, k)),
                pl.BlockSpec((tk_, D), lambda i, k: (k, 0)),
                pl.BlockSpec((1, D), lambda i, k: (0, 0)),
                pl.BlockSpec((tm_, D), lambda i, k: (i, 0)),
                pl.BlockSpec((1, D), lambda i, k: (0, 0)),
                pl.BlockSpec((1, D), lambda i, k: (0, 0)),
            ],
            out_specs=pl.BlockSpec((tm_, D), lambda i, k: (i, 0)),
            scratch_shapes=[pltpu.VMEM((tm_, D), jnp.float32)]),
        compiler_params=pltpu.CompilerParams(
            dimension_semantics=("parallel", "arbitrary")),
    )(xp, wp, b.reshape(1, D), rp, gamma.reshape(1, D), beta.reshape(1, D))
    return out[:M]


def ffn_residual_ln(x, w1, b1, w2, b2, gamma, beta, tm=LIN_TM, tf=LIN_TK):
    """LayerNorm(relu(x@w1+b1)@w2 + b2 + x) * gamma + beta, fused in one pallas_call."""
    M, D = x.shape
    F = w1.shape[1]
    tm_ = _tile(M, tm, 8)
    tf_ = _tile(F, tf, 128)

    xp = _pad_axis(x, 0, tm_)
    w1p = _pad_axis(w1, 1, tf_)
    b1p = _pad_axis(b1.reshape(1, F), 1, tf_)
    w2p = _pad_axis(w2, 0, tf_)
    Mp = xp.shape[0]
    Fp = w1p.shape[1]

    out = pl.pallas_call(
        functools.partial(_ffn_ln_kernel, eps=LN_EPS),
        out_shape=jax.ShapeDtypeStruct((Mp, D), jnp.bfloat16),
        grid_spec=pltpu.PrefetchScalarGridSpec(
            num_scalar_prefetch=0,
            grid=(Mp // tm_, Fp // tf_),
            in_specs=[
                pl.BlockSpec((tm_, D), lambda i, f: (i, 0)),
                pl.BlockSpec((D, tf_), lambda i, f: (0, f)),
                pl.BlockSpec((1, tf_), lambda i, f: (0, f)),
                pl.BlockSpec((tf_, D), lambda i, f: (f, 0)),
                pl.BlockSpec((1, D), lambda i, f: (0, 0)),
                pl.BlockSpec((1, D), lambda i, f: (0, 0)),
                pl.BlockSpec((1, D), lambda i, f: (0, 0)),
            ],
            out_specs=pl.BlockSpec((tm_, D), lambda i, f: (i, 0)),
            scratch_shapes=[pltpu.VMEM((tm_, D), jnp.float32)]),
        compiler_params=pltpu.CompilerParams(
            dimension_semantics=("parallel", "arbitrary")),
    )(xp, w1p, b1p, w2p, b2.reshape(1, D), gamma.reshape(1, D), beta.reshape(1, D))
    return out[:M]


# 32 MiB scoped VMEM is a safe raise on v5e (16 MiB default) and <= default on v6e/v7x.
_ATTN_VMEM = 32 * 1024 * 1024


def mha_self_attention(qkv, mask, n_head, d_model):
    """qkv: [B, S, 3D] bf16 (fused Q|K|V), mask: [B, S, S] bf16 -> [B, S, D] bf16."""
    B, S, C = qkv.shape
    dh = d_model // n_head
    scale = 1.0 / math.sqrt(dh)
    return pl.pallas_call(
        functools.partial(_mha_self_kernel, n_head=n_head, scale=scale, d=d_model),
        out_shape=jax.ShapeDtypeStruct((B, S, d_model), jnp.bfloat16),
        grid=(B,),
        in_specs=[
            pl.BlockSpec((1, S, C), lambda b: (b, 0, 0)),
            pl.BlockSpec((1, S, S), lambda b: (b, 0, 0)),
        ],
        out_specs=pl.BlockSpec((1, S, d_model), lambda b: (b, 0, 0)),
        compiler_params=pltpu.CompilerParams(
            dimension_semantics=("parallel",),
            vmem_limit_bytes=_ATTN_VMEM),
    )(qkv, mask)


def mha_cross_attention(q, kv, mask, n_head, d_model):
    """q: [B, St, D] bf16, kv: [B, Ss, 2D] bf16 (fused K|V), mask: [B, St, Ss] bf16."""
    B, St, D = q.shape
    Ss = kv.shape[1]
    dh = d_model // n_head
    scale = 1.0 / math.sqrt(dh)
    return pl.pallas_call(
        functools.partial(_mha_cross_kernel, n_head=n_head, scale=scale, d=d_model),
        out_shape=jax.ShapeDtypeStruct((B, St, d_model), jnp.bfloat16),
        grid=(B,),
        in_specs=[
            pl.BlockSpec((1, St, D), lambda b: (b, 0, 0)),
            pl.BlockSpec((1, Ss, 2 * d_model), lambda b: (b, 0, 0)),
            pl.BlockSpec((1, St, Ss), lambda b: (b, 0, 0)),
        ],
        out_specs=pl.BlockSpec((1, St, d_model), lambda b: (b, 0, 0)),
        compiler_params=pltpu.CompilerParams(
            dimension_semantics=("parallel",),
            vmem_limit_bytes=_ATTN_VMEM),
    )(q, kv, mask)


# ----------------------------------------------------------------------------
# Model glue (plain JAX): masks, embeddings, layer wiring
# ----------------------------------------------------------------------------

def encoder_layer(x, src_mask, p, n_head):
    B, S, D = x.shape
    x2d = x.reshape(B * S, D)
    ap = p["attn"]

    # fused Q|K|V projection -> fed straight into attention (no JAX-side split copies)
    qkv = tiled_linear(x2d, ap["wqkv"], ap["bqkv"]).reshape(B, S, 3 * D)
    a = mha_self_attention(qkv, src_mask, n_head, D)
    x1 = linear_residual_ln(a.reshape(B * S, D), ap["wo"], ap["bo"],
                            x2d, p["ln1_g"], p["ln1_b"])      # o-proj + add + LN1
    x2 = ffn_residual_ln(x1, p["w1"], p["b1"], p["w2"], p["b2"],
                         p["ln2_g"], p["ln2_b"])              # FFN + add + LN2
    return x2.reshape(B, S, D)


def decoder_layer(y, enc, trg_mask, src_trg_mask, p, n_head):
    B, St, D = y.shape
    Ss = enc.shape[1]
    y2d = y.reshape(B * St, D)
    enc2d = enc.reshape(B * Ss, D)

    # masked self-attention
    sp = p["self_attn"]
    qkv = tiled_linear(y2d, sp["wqkv"], sp["bqkv"]).reshape(B, St, 3 * D)
    a = mha_self_attention(qkv, trg_mask, n_head, D)
    y1 = linear_residual_ln(a.reshape(B * St, D), sp["wo"], sp["bo"],
                            y2d, p["ln1_g"], p["ln1_b"])

    # encoder-decoder cross attention (fused K|V projection of the encoder output)
    cp = p["cross_attn"]
    q = tiled_linear(y1, cp["wq"], cp["bq"]).reshape(B, St, D)
    kv = tiled_linear(enc2d, cp["wkv"], cp["bkv"]).reshape(B, Ss, 2 * D)
    c = mha_cross_attention(q, kv, src_trg_mask, n_head, D)
    y2 = linear_residual_ln(c.reshape(B * St, D), cp["wo"], cp["bo"],
                            y1, p["ln2_g"], p["ln2_b"])

    # FFN
    y3 = ffn_residual_ln(y2, p["w1"], p["b1"], p["w2"], p["b2"],
                         p["ln3_g"], p["ln3_b"])
    return y3.reshape(B, St, D)


def make_pad_mask(q_tok, k_tok, pad_idx):
    # NOTE: reference code uses src_pad_idx for BOTH q and k (reproduced here).
    k_ok = (k_tok != pad_idx)[:, None, :]   # [B, 1, Sk]
    q_ok = (q_tok != pad_idx)[:, :, None]   # [B, Sq, 1]
    return k_ok & q_ok                      # [B, Sq, Sk] bool


def make_no_peak_mask(len_q, len_k):
    return jnp.tril(jnp.ones((len_q, len_k), dtype=bool))


def sinusoid_pos_encoding(max_len, d_model):
    pos = np.arange(max_len, dtype=np.float32)[:, None]
    two_i = np.arange(0, d_model, 2, dtype=np.float32)[None, :]
    angle = pos / np.power(10000.0, two_i / d_model)
    pe = np.zeros((max_len, d_model), dtype=np.float32)
    pe[:, 0::2] = np.sin(angle)
    pe[:, 1::2] = np.cos(angle)
    return jnp.asarray(pe)


def transformer_forward(params, src_tok, trg_tok, cfg):
    pad = cfg["src_pad_idx"]
    n_head = cfg["n_head"]
    B, Ss = src_tok.shape
    St = trg_tok.shape[1]
    D = cfg["d_model"]

    # masks as bf16 (1 keep / 0 masked); shared across heads, half the HBM of f32
    src_mask = make_pad_mask(src_tok, src_tok, pad).astype(jnp.bfloat16)
    src_trg_mask = make_pad_mask(trg_tok, src_tok, pad).astype(jnp.bfloat16)
    trg_mask = (make_pad_mask(trg_tok, trg_tok, pad)
                & make_no_peak_mask(St, St)[None]).astype(jnp.bfloat16)

    # embeddings: token lookup + sinusoidal positional encoding (dropout = identity);
    # activations carried in bf16 between kernels
    src = (params["src_emb"][src_tok] + params["pos_enc"][:Ss][None]).astype(jnp.bfloat16)
    trg = (params["trg_emb"][trg_tok] + params["pos_enc"][:St][None]).astype(jnp.bfloat16)

    # encoder
    x = src
    for lp in params["enc_layers"]:
        x = encoder_layer(x, src_mask, lp, n_head)
    enc = x

    # decoder
    y = trg
    for lp in params["dec_layers"]:
        y = decoder_layer(y, enc, trg_mask, src_trg_mask, lp, n_head)

    # final projection to target vocabulary (N-tiled; logits kept in f32)
    out = tiled_linear(y.reshape(B * St, D), params["w_out"], params["b_out"],
                       out_dtype=jnp.float32)
    return out.reshape(B, St, cfg["trg_voc_size"])


# ----------------------------------------------------------------------------
# Deterministic parameter construction (weights in bf16 for the MXU, rest f32)
# ----------------------------------------------------------------------------

def init_params(key, cfg):
    D, F, L = cfg["d_model"], cfg["ffn_hidden"], cfg["n_layers"]
    Vs, Vt = cfg["src_voc_size"], cfg["trg_voc_size"]
    keys = iter(jax.random.split(key, 512))

    def lin(fi, fo):
        bound = 1.0 / math.sqrt(fi)
        w = jax.random.uniform(next(keys), (fi, fo), jnp.float32, -bound, bound)
        b = jax.random.uniform(next(keys), (fo,), jnp.float32, -bound, bound)
        return w.astype(jnp.bfloat16), b

    def attn_params():
        wq, bq = lin(D, D)
        wk, bk = lin(D, D)
        wv, bv = lin(D, D)
        wo, bo = lin(D, D)
        return dict(
            wq=wq, bq=bq,
            wkv=jnp.concatenate([wk, wv], axis=1), bkv=jnp.concatenate([bk, bv]),
            wqkv=jnp.concatenate([wq, wk, wv], axis=1),
            bqkv=jnp.concatenate([bq, bk, bv]),
            wo=wo, bo=bo)

    def enc_layer():
        w1, b1 = lin(D, F)
        w2, b2 = lin(F, D)
        return dict(attn=attn_params(),
                    ln1_g=jnp.ones((D,), jnp.float32), ln1_b=jnp.zeros((D,), jnp.float32),
                    w1=w1, b1=b1, w2=w2, b2=b2,
                    ln2_g=jnp.ones((D,), jnp.float32), ln2_b=jnp.zeros((D,), jnp.float32))

    def dec_layer():
        w1, b1 = lin(D, F)
        w2, b2 = lin(F, D)
        return dict(self_attn=attn_params(), cross_attn=attn_params(),
                    ln1_g=jnp.ones((D,), jnp.float32), ln1_b=jnp.zeros((D,), jnp.float32),
                    ln2_g=jnp.ones((D,), jnp.float32), ln2_b=jnp.zeros((D,), jnp.float32),
                    w1=w1, b1=b1, w2=w2, b2=b2,
                    ln3_g=jnp.ones((D,), jnp.float32), ln3_b=jnp.zeros((D,), jnp.float32))

    src_emb = 0.02 * jax.random.normal(next(keys), (Vs, D), jnp.float32)
    trg_emb = 0.02 * jax.random.normal(next(keys), (Vt, D), jnp.float32)
    # padding_idx row is zero (nn.Embedding(..., padding_idx=pad))
    src_emb = src_emb.at[cfg["src_pad_idx"]].set(0.0)
    trg_emb = trg_emb.at[cfg["trg_pad_idx"]].set(0.0)

    w_out, b_out = lin(D, Vt)

    return dict(
        src_emb=src_emb,
        trg_emb=trg_emb,
        pos_enc=sinusoid_pos_encoding(cfg["max_len"], D),
        enc_layers=[enc_layer() for _ in range(L)],
        dec_layers=[dec_layer() for _ in range(L)],
        w_out=w_out, b_out=b_out,
    )


# ----------------------------------------------------------------------------
# Main
# ----------------------------------------------------------------------------

if __name__ == "__main__":
    cfg = dict(
        src_pad_idx=0, trg_pad_idx=0, trg_sos_idx=1,
        src_voc_size=20, trg_voc_size=20,
        d_model=32, n_head=4, max_len=16,
        ffn_hidden=64, n_layers=2, drop_prob=0.0,
    )
    B, S = 2, 8

    root = jax.random.PRNGKey(0)
    k_p, k_src, k_trg = jax.random.split(root, 3)
    params = init_params(k_p, cfg)

    src = jax.random.randint(k_src, (B, S), 2, cfg["src_voc_size"], dtype=jnp.int32)
    trg = jax.random.randint(k_trg, (B, S), 2, cfg["trg_voc_size"], dtype=jnp.int32)
    # introduce some padding tokens so the pad masks are exercised
    src = src.at[:, -2:].set(cfg["src_pad_idx"])
    trg = trg.at[:, -1:].set(cfg["trg_pad_idx"])

    fwd = jax.jit(lambda p, s, t: transformer_forward(p, s, t, cfg))
    out = fwd(params, src, trg)
    out = jax.block_until_ready(out)

    assert out.shape == (B, S, cfg["trg_voc_size"]), out.shape
    assert bool(jnp.all(jnp.isfinite(out)))
    print("KERNEL_OK")
</pallas_src>

<mosaic_0001>
module attributes {stable_mosaic.version = 11 : i64} {
  func.func @_linear_res_ln_kernel(%arg0: i32, %arg1: i32, %arg2: memref<16x32xbf16, #tpu.memory_space<vmem>>, %arg3: memref<32x32xbf16, #tpu.memory_space<vmem>>, %arg4: memref<1x32xf32, #tpu.memory_space<vmem>>, %arg5: memref<16x32xbf16, #tpu.memory_space<vmem>>, %arg6: memref<1x32xf32, #tpu.memory_space<vmem>>, %arg7: memref<1x32xf32, #tpu.memory_space<vmem>>, %arg8: memref<16x32xbf16, #tpu.memory_space<vmem>>, %arg9: memref<16x32xf32, #tpu.memory_space<vmem>>) attributes {dimension_semantics = [#tpu.dimension_semantics<parallel>, #tpu.dimension_semantics<arbitrary>], iteration_bounds = array<i64: 1, 1>, scalar_prefetch = 0 : i64, scratch_operands = 1 : i64, tpu.core_type = #tpu.core_type<tc>, window_params = [{transform_indices = @transform_0, window_bounds = array<i64: 16, 32>}, {transform_indices = @transform_1, window_bounds = array<i64: 32, 32>}, {pipeline_mode = #tpu.pipeline_mode<synchronous>, transform_indices = @transform_2, window_bounds = array<i64: 1, 32>}, {transform_indices = @transform_3, window_bounds = array<i64: 16, 32>}, {pipeline_mode = #tpu.pipeline_mode<synchronous>, transform_indices = @transform_4, window_bounds = array<i64: 1, 32>}, {pipeline_mode = #tpu.pipeline_mode<synchronous>, transform_indices = @transform_5, window_bounds = array<i64: 1, 32>}, {transform_indices = @transform_6, window_bounds = array<i64: 16, 32>}]} {
    %c0_i32 = arith.constant 0 : i32
    %0 = arith.cmpi eq, %arg1, %c0_i32 : i32
    %1 = arith.extui %0 : i1 to i32
    %c0_i32_0 = arith.constant 0 : i32
    %2 = arith.cmpi ne, %1, %c0_i32_0 : i32
    scf.if %2 {
      %cst_10 = arith.constant 0.000000e+00 : f32
      %12 = vector.broadcast %cst_10 : f32 to vector<16x32xf32>
      %c0_11 = arith.constant 0 : index
      %c0_12 = arith.constant 0 : index
      %13 = vector.load %arg9[%c0_11, %c0_12] : memref<16x32xf32, #tpu.memory_space<vmem>>, vector<16x32xf32>
      tpu.vector_store %arg9[%c0_11, %c0_12], %12 {strides = array<i32>} : memref<16x32xf32, #tpu.memory_space<vmem>>, vector<16x32xf32>,
    } else {
    }
    %c0 = arith.constant 0 : index
    %c0_1 = arith.constant 0 : index
    %3 = vector.load %arg9[%c0, %c0_1] : memref<16x32xf32, #tpu.memory_space<vmem>>, vector<16x32xf32>
    %c0_2 = arith.constant 0 : index
    %c0_3 = arith.constant 0 : index
    %4 = vector.load %arg2[%c0_2, %c0_3] : memref<16x32xbf16, #tpu.memory_space<vmem>>, vector<16x32xbf16>
    %c0_4 = arith.constant 0 : index
    %c0_5 = arith.constant 0 : index
    %5 = vector.load %arg3[%c0_4, %c0_5] : memref<32x32xbf16, #tpu.memory_space<vmem>>, vector<32x32xbf16>
    %cst = arith.constant dense<0.000000e+00> : vector<16x32xf32>
    %6 = tpu.matmul %4, %5, %cst {dimension_numbers = #tpu.dot_dimension_numbers<[1], [0], [0], [1], [0, 0, 1, 1], [], []>} : vector<16x32xbf16>, vector<32x32xbf16>, vector<16x32xf32> -> vector<16x32xf32>
    %7 = arith.addf %3, %6 : vector<16x32xf32>
    %c0_6 = arith.constant 0 : index
    %c0_7 = arith.constant 0 : index
    %8 = vector.load %arg9[%c0_6, %c0_7] : memref<16x32xf32, #tpu.memory_space<vmem>>, vector<16x32xf32>
    tpu.vector_store %arg9[%c0_6, %c0_7], %7 {strides = array<i32>} : memref<16x32xf32, #tpu.memory_space<vmem>>, vector<16x32xf32>,
    %c0_i32_8 = arith.constant 0 : i32
    %9 = arith.cmpi eq, %arg1, %c0_i32_8 : i32
    %10 = arith.extui %9 : i1 to i32
    %c0_i32_9 = arith.constant 0 : i32
    %11 = arith.cmpi ne, %10, %c0_i32_9 : i32
    scf.if %11 {
      %c0_10 = arith.constant 0 : index
      %c0_11 = arith.constant 0 : index
      %12 = vector.load %arg9[%c0_10, %c0_11] : memref<16x32xf32, #tpu.memory_space<vmem>>, vector<16x32xf32>
      %c0_12 = arith.constant 0 : index
      %c0_13 = arith.constant 0 : index
      %13 = vector.load %arg4[%c0_12, %c0_13] : memref<1x32xf32, #tpu.memory_space<vmem>>, vector<1x32xf32>
      %14 = vector.broadcast %13 : vector<1x32xf32> to vector<16x32xf32>
      %15 = arith.addf %12, %14 : vector<16x32xf32>
      %c0_14 = arith.constant 0 : index
      %c0_15 = arith.constant 0 : index
      %16 = vector.load %arg5[%c0_14, %c0_15] : memref<16x32xbf16, #tpu.memory_space<vmem>>, vector<16x32xbf16>
      %17 = arith.extf %16 : vector<16x32xbf16> to vector<16x32xf32>
      %18 = arith.addf %15, %17 : vector<16x32xf32>
      %cst_16 = arith.constant dense<0.000000e+00> : vector<16xf32>
      %19 = vector.multi_reduction <add>, %18, %cst_16 [1] : vector<16x32xf32> to vector<16xf32>
      %20 = vector.shape_cast %19 : vector<16xf32> to vector<16x1xf32>
      %cst_17 = arith.constant 3.200000e+01 : f32
      %21 = vector.broadcast %cst_17 : f32 to vector<16x1xf32>
      %22 = arith.divf %20, %21 : vector<16x1xf32>
      %23 = vector.broadcast %22 : vector<16x1xf32> to vector<16x32xf32>
      %24 = arith.subf %18, %23 : vector<16x32xf32>
      %25 = arith.mulf %24, %24 : vector<16x32xf32>
      %cst_18 = arith.constant dense<0.000000e+00> : vector<16xf32>
      %26 = vector.multi_reduction <add>, %25, %cst_18 [1] : vector<16x32xf32> to vector<16xf32>
      %27 = vector.shape_cast %26 : vector<16xf32> to vector<16x1xf32>
      %cst_19 = arith.constant 3.200000e+01 : f32
      %28 = vector.broadcast %cst_19 : f32 to vector<16x1xf32>
      %29 = arith.divf %27, %28 : vector<16x1xf32>
      %30 = vector.broadcast %22 : vector<16x1xf32> to vector<16x32xf32>
      %31 = arith.subf %18, %30 : vector<16x32xf32>
      %cst_20 = arith.constant 9.99999996E-13 : f32
      %32 = vector.broadcast %cst_20 : f32 to vector<16x1xf32>
      %33 = arith.addf %29, %32 : vector<16x1xf32>
      %34 = math.rsqrt %33 : vector<16x1xf32>
      %35 = vector.broadcast %34 : vector<16x1xf32> to vector<16x32xf32>
      %36 = arith.mulf %31, %35 : vector<16x32xf32>
      %c0_21 = arith.constant 0 : index
      %c0_22 = arith.constant 0 : index
      %37 = vector.load %arg6[%c0_21, %c0_22] : memref<1x32xf32, #tpu.memory_space<vmem>>, vector<1x32xf32>
      %38 = vector.broadcast %37 : vector<1x32xf32> to vector<16x32xf32>
      %39 = arith.mulf %36, %38 : vector<16x32xf32>
      %c0_23 = arith.constant 0 : index
      %c0_24 = arith.constant 0 : index
      %40 = vector.load %arg7[%c0_23, %c0_24] : memref<1x32xf32, #tpu.memory_space<vmem>>, vector<1x32xf32>
      %41 = vector.broadcast %40 : vector<1x32xf32> to vector<16x32xf32>
      %42 = arith.addf %39, %41 : vector<16x32xf32>
      %43 = arith.truncf %42 : vector<16x32xf32> to vector<16x32xbf16>
      %c0_25 = arith.constant 0 : index
      %c0_26 = arith.constant 0 : index
      %44 = vector.load %arg8[%c0_25, %c0_26] : memref<16x32xbf16, #tpu.memory_space<vmem>>, vector<16x32xbf16>
      tpu.vector_store %arg8[%c0_25, %c0_26], %43 {strides = array<i32>} : memref<16x32xbf16, #tpu.memory_space<vmem>>, vector<16x32xbf16>,
    } else {
    }
    return
  }
  func.func @transform_0(%arg0: i32, %arg1: i32) -> (i32, i32) {
    %c0_i32 = arith.constant 0 : i32
    return %arg0, %arg1 : i32, i32
  }
  func.func @transform_1(%arg0: i32, %arg1: i32) -> (i32, i32) {
    %c0_i32 = arith.constant 0 : i32
    %c0_i32_0 = arith.constant 0 : i32
    return %arg1, %c0_i32 : i32, i32
  }
  func.func @transform_2(%arg0: i32, %arg1: i32) -> (i32, i32) {
    %c0_i32 = arith.constant 0 : i32
    %c0_i32_0 = arith.constant 0 : i32
    %c0_i32_1 = arith.constant 0 : i32
    return %c0_i32, %c0_i32_0 : i32, i32
  }
  func.func @transform_3(%arg0: i32, %arg1: i32) -> (i32, i32) {
    %c0_i32 = arith.constant 0 : i32
    %c0_i32_0 = arith.constant 0 : i32
    return %arg0, %c0_i32 : i32, i32
  }
  func.func @transform_4(%arg0: i32, %arg1: i32) -> (i32, i32) {
    %c0_i32 = arith.constant 0 : i32
    %c0_i32_0 = arith.constant 0 : i32
    %c0_i32_1 = arith.constant 0 : i32
    return %c0_i32, %c0_i32_0 : i32, i32
  }
  func.func @transform_5(%arg0: i32, %arg1: i32) -> (i32, i32) {
    %c0_i32 = arith.constant 0 : i32
    %c0_i32_0 = arith.constant 0 : i32
    %c0_i32_1 = arith.constant 0 : i32
    return %c0_i32, %c0_i32_0 : i32, i32
  }
  func.func @transform_6(%arg0: i32, %arg1: i32) -> (i32, i32) {
    %c0_i32 = arith.constant 0 : i32
    %c0_i32_0 = arith.constant 0 : i32
    return %arg0, %c0_i32 : i32, i32
  }
}

module attributes {stable_mosaic.version = 11 : i64} {
  func.func @_mha_self_kernel(%arg0: i32, %arg1: memref<1x8x96xbf16, #tpu.memory_space<vmem>>, %arg2: memref<1x8x8xbf16, #tpu.memory_space<vmem>>, %arg3: memref<1x8x32xbf16, #tpu.memory_space<vmem>>) attributes {dimension_semantics = [#tpu.dimension_semantics<parallel>], iteration_bounds = array<i64: 2>, scalar_prefetch = 0 : i64, scratch_operands = 0 : i64, tpu.core_type = #tpu.core_type<tc>, window_params = [{transform_indices = @transform_0, window_bounds = array<i64: 1, 8, 96>}, {transform_indices = @transform_1, window_bounds = array<i64: 1, 8, 8>}, {transform_indices = @transform_2, window_bounds = array<i64: 1, 8, 32>}]} {
    %c0 = arith.constant 0 : index
    %c0_0 = arith.constant 0 : index
    %c0_1 = arith.constant 0 : index
    %0 = vector.load %arg1[%c0, %c0_0, %c0_1] : memref<1x8x96xbf16, #tpu.memory_space<vmem>>, vector<1x8x96xbf16>
    %1 = vector.shape_cast %0 : vector<1x8x96xbf16> to vector<8x96xbf16>
    %2 = vector.extract_strided_slice %1 {offsets = [0, 0], sizes = [8, 32], strides = [1, 1]} : vector<8x96xbf16> to vector<8x32xbf16>
    %cst = arith.constant 3.535160e-01 : bf16
    %3 = vector.broadcast %cst : bf16 to vector<8x32xbf16>
    %4 = arith.mulf %2, %3 : vector<8x32xbf16>
    %5 = vector.extract_strided_slice %1 {offsets = [0, 32], sizes = [8, 32], strides = [1, 1]} : vector<8x96xbf16> to vector<8x32xbf16>
    %6 = vector.extract_strided_slice %1 {offsets = [0, 64], sizes = [8, 32], strides = [1, 1]} : vector<8x96xbf16> to vector<8x32xbf16>
    %c0_2 = arith.constant 0 : index
    %c0_3 = arith.constant 0 : index
    %c0_4 = arith.constant 0 : index
    %7 = vector.load %arg2[%c0_2, %c0_3, %c0_4] : memref<1x8x8xbf16, #tpu.memory_space<vmem>>, vector<1x8x8xbf16>
    %8 = vector.shape_cast %7 : vector<1x8x8xbf16> to vector<8x8xbf16>
    %cst_5 = arith.constant 0.000000e+00 : bf16
    %9 = vector.broadcast %cst_5 : bf16 to vector<8x8xbf16>
    %10 = arith.cmpf ogt, %8, %9 : vector<8x8xbf16>
    %11 = vector.extract_strided_slice %4 {offsets = [0, 0], sizes = [8, 8], strides = [1, 1]} : vector<8x32xbf16> to vector<8x8xbf16>
    %12 = vector.extract_strided_slice %4 {offsets = [0, 8], sizes = [8, 8], strides = [1, 1]} : vector<8x32xbf16> to vector<8x8xbf16>
    %13 = vector.extract_strided_slice %4 {offsets = [0, 16], sizes = [8, 8], strides = [1, 1]} : vector<8x32xbf16> to vector<8x8xbf16>
    %14 = vector.extract_strided_slice %4 {offsets = [0, 24], sizes = [8, 8], strides = [1, 1]} : vector<8x32xbf16> to vector<8x8xbf16>
    %15 = vector.shape_cast %11 : vector<8x8xbf16> to vector<1x8x8xbf16>
    %16 = vector.shape_cast %12 : vector<8x8xbf16> to vector<1x8x8xbf16>
    %17 = vector.shape_cast %13 : vector<8x8xbf16> to vector<1x8x8xbf16>
    %18 = vector.shape_cast %14 : vector<8x8xbf16> to vector<1x8x8xbf16>
    %19 = tpu.concatenate %15, %16, %17, %18 in 0 : vector<1x8x8xbf16>, vector<1x8x8xbf16>, vector<1x8x8xbf16>, vector<1x8x8xbf16> -> vector<4x8x8xbf16>
    %20 = vector.extract_strided_slice %5 {offsets = [0, 0], sizes = [8, 8], strides = [1, 1]} : vector<8x32xbf16> to vector<8x8xbf16>
    %21 = vector.extract_strided_slice %5 {offsets = [0, 8], sizes = [8, 8], strides = [1, 1]} : vector<8x32xbf16> to vector<8x8xbf16>
    %22 = vector.extract_strided_slice %5 {offsets = [0, 16], sizes = [8, 8], strides = [1, 1]} : vector<8x32xbf16> to vector<8x8xbf16>
    %23 = vector.extract_strided_slice %5 {offsets = [0, 24], sizes = [8, 8], strides = [1, 1]} : vector<8x32xbf16> to vector<8x8xbf16>
    %24 = vector.shape_cast %20 : vector<8x8xbf16> to vector<1x8x8xbf16>
    %25 = vector.shape_cast %21 : vector<8x8xbf16> to vector<1x8x8xbf16>
    %26 = vector.shape_cast %22 : vector<8x8xbf16> to vector<1x8x8xbf16>
    %27 = vector.shape_cast %23 : vector<8x8xbf16> to vector<1x8x8xbf16>
    %28 = tpu.concatenate %24, %25, %26, %27 in 0 : vector<1x8x8xbf16>, vector<1x8x8xbf16>, vector<1x8x8xbf16>, vector<1x8x8xbf16> -> vector<4x8x8xbf16>
    %29 = vector.extract_strided_slice %6 {offsets = [0, 0], sizes = [8, 8], strides = [1, 1]} : vector<8x32xbf16> to vector<8x8xbf16>
    %30 = vector.extract_strided_slice %6 {offsets = [0, 8], sizes = [8, 8], strides = [1, 1]} : vector<8x32xbf16> to vector<8x8xbf16>
    %31 = vector.extract_strided_slice %6 {offsets = [0, 16], sizes = [8, 8], strides = [1, 1]} : vector<8x32xbf16> to vector<8x8xbf16>
    %32 = vector.extract_strided_slice %6 {offsets = [0, 24], sizes = [8, 8], strides = [1, 1]} : vector<8x32xbf16> to vector<8x8xbf16>
    %33 = vector.shape_cast %29 : vector<8x8xbf16> to vector<1x8x8xbf16>
    %34 = vector.shape_cast %30 : vector<8x8xbf16> to vector<1x8x8xbf16>
    %35 = vector.shape_cast %31 : vector<8x8xbf16> to vector<1x8x8xbf16>
    %36 = vector.shape_cast %32 : vector<8x8xbf16> to vector<1x8x8xbf16>
    %37 = tpu.concatenate %33, %34, %35, %36 in 0 : vector<1x8x8xbf16>, vector<1x8x8xbf16>, vector<1x8x8xbf16>, vector<1x8x8xbf16> -> vector<4x8x8xbf16>
    %cst_6 = arith.constant dense<0.000000e+00> : vector<4x8x8xf32>
    %38 = tpu.matmul %19, %28, %cst_6 {dimension_numbers = #tpu.dot_dimension_numbers<[2], [2], [1], [1], [0, 0, 0, 1, 1, 1], [0], [0]>} : vector<4x8x8xbf16>, vector<4x8x8xbf16>, vector<4x8x8xf32> -> vector<4x8x8xf32>
    %39 = vector.shape_cast %10 : vector<8x8xi1> to vector<1x8x8xi1>
    %cst_7 = arith.constant -1.000000e+04 : f32
    %40 = vector.shape_cast %39 : vector<1x8x8xi1> to vector<1x8x8xi1>
    %41 = vector.broadcast %40 : vector<1x8x8xi1> to vector<4x8x8xi1>
    %42 = vector.broadcast %cst_7 : f32 to vector<4x8x8xf32>
    %43 = arith.select %41, %38, %42 : vector<4x8x8xi1>, vector<4x8x8xf32>
    %cst_8 = arith.constant dense<0xFF800000> : vector<4x8xf32>
    %44 = vector.multi_reduction <maximumf>, %43, %cst_8 [2] : vector<4x8x8xf32> to vector<4x8xf32>
    %45 = vector.shape_cast %44 : vector<4x8xf32> to vector<4x8x1xf32>
    %46 = vector.broadcast %45 : vector<4x8x1xf32> to vector<4x8x8xf32>
    %47 = arith.subf %43, %46 : vector<4x8x8xf32>
    %48 = math.exp %47 : vector<4x8x8xf32>
    %cst_9 = arith.constant dense<0.000000e+00> : vector<4x8xf32>
    %49 = vector.multi_reduction <add>, %48, %cst_9 [2] : vector<4x8x8xf32> to vector<4x8xf32>
    %50 = vector.shape_cast %49 : vector<4x8xf32> to vector<4x8x1xf32>
    %51 = tpu.reciprocal %50 {approx = true} : vector<4x8x1xf32> -> vector<4x8x1xf32>
    %52 = vector.broadcast %51 : vector<4x8x1xf32> to vector<4x8x8xf32>
    %53 = arith.mulf %48, %52 : vector<4x8x8xf32>
    %54 = arith.truncf %53 : vector<4x8x8xf32> to vector<4x8x8xbf16>
    %cst_10 = arith.constant dense<0.000000e+00> : vector<4x8x8xf32>
    %55 = tpu.matmul %54, %37, %cst_10 {dimension_numbers = #tpu.dot_dimension_numbers<[2], [1], [1], [2], [0, 0, 0, 1, 1, 2], [0], [0]>} : vector<4x8x8xbf16>, vector<4x8x8xbf16>, vector<4x8x8xf32> -> vector<4x8x8xf32>
    %56 = vector.extract_strided_slice %55 {offsets = [0, 0, 0], sizes = [1, 8, 8], strides = [1, 1, 1]} : vector<4x8x8xf32> to vector<1x8x8xf32>
    %57 = vector.shape_cast %56 : vector<1x8x8xf32> to vector<8x8xf32>
    %58 = vector.extract_strided_slice %55 {offsets = [1, 0, 0], sizes = [1, 8, 8], strides = [1, 1, 1]} : vector<4x8x8xf32> to vector<1x8x8xf32>
    %59 = vector.shape_cast %58 : vector<1x8x8xf32> to vector<8x8xf32>
    %60 = vector.extract_strided_slice %55 {offsets = [2, 0, 0], sizes = [1, 8, 8], strides = [1, 1, 1]} : vector<4x8x8xf32> to vector<1x8x8xf32>
    %61 = vector.shape_cast %60 : vector<1x8x8xf32> to vector<8x8xf32>
    %62 = vector.extract_strided_slice %55 {offsets = [3, 0, 0], sizes = [1, 8, 8], strides = [1, 1, 1]} : vector<4x8x8xf32> to vector<1x8x8xf32>
    %63 = vector.shape_cast %62 : vector<1x8x8xf32> to vector<8x8xf32>
    %64 = tpu.concatenate %57, %59, %61, %63 in 1 : vector<8x8xf32>, vector<8x8xf32>, vector<8x8xf32>, vector<8x8xf32> -> vector<8x32xf32>
    %65 = arith.truncf %64 : vector<8x32xf32> to vector<8x32xbf16>
    %c0_11 = arith.constant 0 : index
    %c0_12 = arith.constant 0 : index
    %c0_13 = arith.constant 0 : index
    %66 = vector.load %arg3[%c0_11, %c0_12, %c0_13] : memref<1x8x32xbf16, #tpu.memory_space<vmem>>, vector<1x8x32xbf16>
    %67 = vector.shape_cast %66 : vector<1x8x32xbf16> to vector<8x32xbf16>
    %68 = vector.shape_cast %65 : vector<8x32xbf16> to vector<1x8x32xbf16>
    tpu.vector_store %arg3[%c0_11, %c0_12, %c0_13], %68 {strides = array<i32>} : memref<1x8x32xbf16, #tpu.memory_space<vmem>>, vector<1x8x32xbf16>,
    return
  }
  func.func @transform_0(%arg0: i32) -> (i32, i32, i32) {
    %c0_i32 = arith.constant 0 : i32
    %c0_i32_0 = arith.constant 0 : i32
    %c0_i32_1 = arith.constant 0 : i32
    return %arg0, %c0_i32, %c0_i32_0 : i32, i32, i32
  }
  func.func @transform_1(%arg0: i32) -> (i32, i32, i32) {
    %c0_i32 = arith.constant 0 : i32
    %c0_i32_0 = arith.constant 0 : i32
    %c0_i32_1 = arith.constant 0 : i32
    return %arg0, %c0_i32, %c0_i32_0 : i32, i32, i32
  }
  func.func @transform_2(%arg0: i32) -> (i32, i32, i32) {
    %c0_i32 = arith.constant 0 : i32
    %c0_i32_0 = arith.constant 0 : i32
    %c0_i32_1 = arith.constant 0 : i32
    return %arg0, %c0_i32, %c0_i32_0 : i32, i32, i32
  }
}

module attributes {stable_mosaic.version = 11 : i64} {
  func.func @_linear_kernel(%arg0: i32, %arg1: i32, %arg2: i32, %arg3: memref<16x32xbf16, #tpu.memory_space<vmem>>, %arg4: memref<32x96xbf16, #tpu.memory_space<vmem>>, %arg5: memref<1x96xf32, #tpu.memory_space<vmem>>, %arg6: memref<16x96xbf16, #tpu.memory_space<vmem>>, %arg7: memref<16x96xf32, #tpu.memory_space<vmem>>) attributes {dimension_semantics = [#tpu.dimension_semantics<parallel>, #tpu.dimension_semantics<parallel>, #tpu.dimension_semantics<arbitrary>], iteration_bounds = array<i64: 1, 1, 1>, scalar_prefetch = 0 : i64, scratch_operands = 1 : i64, tpu.core_type = #tpu.core_type<tc>, window_params = [{transform_indices = @transform_0, window_bounds = array<i64: 16, 32>}, {transform_indices = @transform_1, window_bounds = array<i64: 32, 96>}, {transform_indices = @transform_2, window_bounds = array<i64: 1, 96>}, {transform_indices = @transform_3, window_bounds = array<i64: 16, 96>}]} {
    %c0_i32 = arith.constant 0 : i32
    %0 = arith.cmpi eq, %arg2, %c0_i32 : i32
    %1 = arith.extui %0 : i1 to i32
    %c0_i32_0 = arith.constant 0 : i32
    %2 = arith.cmpi ne, %1, %c0_i32_0 : i32
    scf.if %2 {
      %cst_10 = arith.constant 0.000000e+00 : f32
      %12 = vector.broadcast %cst_10 : f32 to vector<16x96xf32>
      %c0_11 = arith.constant 0 : index
      %c0_12 = arith.constant 0 : index
      %13 = vector.load %arg7[%c0_11, %c0_12] : memref<16x96xf32, #tpu.memory_space<vmem>>, vector<16x96xf32>
      tpu.vector_store %arg7[%c0_11, %c0_12], %12 {strides = array<i32>} : memref<16x96xf32, #tpu.memory_space<vmem>>, vector<16x96xf32>,
    } else {
    }
    %c0 = arith.constant 0 : index
    %c0_1 = arith.constant 0 : index
    %3 = vector.load %arg7[%c0, %c0_1] : memref<16x96xf32, #tpu.memory_space<vmem>>, vector<16x96xf32>
    %c0_2 = arith.constant 0 : index
    %c0_3 = arith.constant 0 : index
    %4 = vector.load %arg3[%c0_2, %c0_3] : memref<16x32xbf16, #tpu.memory_space<vmem>>, vector<16x32xbf16>
    %c0_4 = arith.constant 0 : index
    %c0_5 = arith.constant 0 : index
    %5 = vector.load %arg4[%c0_4, %c0_5] : memref<32x96xbf16, #tpu.memory_space<vmem>>, vector<32x96xbf16>
    %cst = arith.constant dense<0.000000e+00> : vector<16x96xf32>
    %6 = tpu.matmul %4, %5, %cst {dimension_numbers = #tpu.dot_dimension_numbers<[1], [0], [0], [1], [0, 0, 1, 1], [], []>} : vector<16x32xbf16>, vector<32x96xbf16>, vector<16x96xf32> -> vector<16x96xf32>
    %7 = arith.addf %3, %6 : vector<16x96xf32>
    %c0_6 = arith.constant 0 : index
    %c0_7 = arith.constant 0 : index
    %8 = vector.load %arg7[%c0_6, %c0_7] : memref<16x96xf32, #tpu.memory_space<vmem>>, vector<16x96xf32>
    tpu.vector_store %arg7[%c0_6, %c0_7], %7 {strides = array<i32>} : memref<16x96xf32, #tpu.memory_space<vmem>>, vector<16x96xf32>,
    %c0_i32_8 = arith.constant 0 : i32
    %9 = arith.cmpi eq, %arg2, %c0_i32_8 : i32
    %10 = arith.extui %9 : i1 to i32
    %c0_i32_9 = arith.constant 0 : i32
    %11 = arith.cmpi ne, %10, %c0_i32_9 : i32
    scf.if %11 {
      %c0_10 = arith.constant 0 : index
      %c0_11 = arith.constant 0 : index
      %12 = vector.load %arg7[%c0_10, %c0_11] : memref<16x96xf32, #tpu.memory_space<vmem>>, vector<16x96xf32>
      %c0_12 = arith.constant 0 : index
      %c0_13 = arith.constant 0 : index
      %13 = vector.load %arg5[%c0_12, %c0_13] : memref<1x96xf32, #tpu.memory_space<vmem>>, vector<1x96xf32>
      %14 = vector.broadcast %13 : vector<1x96xf32> to vector<16x96xf32>
      %15 = arith.addf %12, %14 : vector<16x96xf32>
      %16 = arith.truncf %15 : vector<16x96xf32> to vector<16x96xbf16>
      %c0_14 = arith.constant 0 : index
      %c0_15 = arith.constant 0 : index
      %17 = vector.load %arg6[%c0_14, %c0_15] : memref<16x96xbf16, #tpu.memory_space<vmem>>, vector<16x96xbf16>
      tpu.vector_store %arg6[%c0_14, %c0_15], %16 {strides = array<i32>} : memref<16x96xbf16, #tpu.memory_space<vmem>>, vector<16x96xbf16>,
    } else {
    }
    return
  }
  func.func @transform_0(%arg0: i32, %arg1: i32, %arg2: i32) -> (i32, i32) {
    %c0_i32 = arith.constant 0 : i32
    return %arg0, %arg2 : i32, i32
  }
  func.func @transform_1(%arg0: i32, %arg1: i32, %arg2: i32) -> (i32, i32) {
    %c0_i32 = arith.constant 0 : i32
    return %arg2, %arg1 : i32, i32
  }
  func.func @transform_2(%arg0: i32, %arg1: i32, %arg2: i32) -> (i32, i32) {
    %c0_i32 = arith.constant 0 : i32
    %c0_i32_0 = arith.constant 0 : i32
    return %c0_i32, %arg1 : i32, i32
  }
  func.func @transform_3(%arg0: i32, %arg1: i32, %arg2: i32) -> (i32, i32) {
    %c0_i32 = arith.constant 0 : i32
    return %arg0, %arg1 : i32, i32
  }
}

module attributes {stable_mosaic.version = 11 : i64} {
  func.func @_ffn_ln_kernel(%arg0: i32, %arg1: i32, %arg2: memref<16x32xbf16, #tpu.memory_space<vmem>>, %arg3: memref<32x64xbf16, #tpu.memory_space<vmem>>, %arg4: memref<1x64xf32, #tpu.memory_space<vmem>>, %arg5: memref<64x32xbf16, #tpu.memory_space<vmem>>, %arg6: memref<1x32xf32, #tpu.memory_space<vmem>>, %arg7: memref<1x32xf32, #tpu.memory_space<vmem>>, %arg8: memref<1x32xf32, #tpu.memory_space<vmem>>, %arg9: memref<16x32xbf16, #tpu.memory_space<vmem>>, %arg10: memref<16x32xf32, #tpu.memory_space<vmem>>) attributes {dimension_semantics = [#tpu.dimension_semantics<parallel>, #tpu.dimension_semantics<arbitrary>], iteration_bounds = array<i64: 1, 1>, scalar_prefetch = 0 : i64, scratch_operands = 1 : i64, tpu.core_type = #tpu.core_type<tc>, window_params = [{transform_indices = @transform_0, window_bounds = array<i64: 16, 32>}, {transform_indices = @transform_1, window_bounds = array<i64: 32, 64>}, {transform_indices = @transform_2, window_bounds = array<i64: 1, 64>}, {transform_indices = @transform_3, window_bounds = array<i64: 64, 32>}, {pipeline_mode = #tpu.pipeline_mode<synchronous>, transform_indices = @transform_4, window_bounds = array<i64: 1, 32>}, {pipeline_mode = #tpu.pipeline_mode<synchronous>, transform_indices = @transform_5, window_bounds = array<i64: 1, 32>}, {pipeline_mode = #tpu.pipeline_mode<synchronous>, transform_indices = @transform_6, window_bounds = array<i64: 1, 32>}, {transform_indices = @transform_7, window_bounds = array<i64: 16, 32>}]} {
    %c0_i32 = arith.constant 0 : i32
    %0 = arith.cmpi eq, %arg1, %c0_i32 : i32
    %1 = arith.extui %0 : i1 to i32
    %c0_i32_0 = arith.constant 0 : i32
    %2 = arith.cmpi ne, %1, %c0_i32_0 : i32
    scf.if %2 {
      %cst_16 = arith.constant 0.000000e+00 : f32
      %20 = vector.broadcast %cst_16 : f32 to vector<16x32xf32>
      %c0_17 = arith.constant 0 : index
      %c0_18 = arith.constant 0 : index
      %21 = vector.load %arg10[%c0_17, %c0_18] : memref<16x32xf32, #tpu.memory_space<vmem>>, vector<16x32xf32>
      tpu.vector_store %arg10[%c0_17, %c0_18], %20 {strides = array<i32>} : memref<16x32xf32, #tpu.memory_space<vmem>>, vector<16x32xf32>,
    } else {
    }
    %c0 = arith.constant 0 : index
    %c0_1 = arith.constant 0 : index
    %3 = vector.load %arg2[%c0, %c0_1] : memref<16x32xbf16, #tpu.memory_space<vmem>>, vector<16x32xbf16>
    %c0_2 = arith.constant 0 : index
    %c0_3 = arith.constant 0 : index
    %4 = vector.load %arg3[%c0_2, %c0_3] : memref<32x64xbf16, #tpu.memory_space<vmem>>, vector<32x64xbf16>
    %cst = arith.constant dense<0.000000e+00> : vector<16x64xf32>
    %5 = tpu.matmul %3, %4, %cst {dimension_numbers = #tpu.dot_dimension_numbers<[1], [0], [0], [1], [0, 0, 1, 1], [], []>} : vector<16x32xbf16>, vector<32x64xbf16>, vector<16x64xf32> -> vector<16x64xf32>
    %c0_4 = arith.constant 0 : index
    %c0_5 = arith.constant 0 : index
    %6 = vector.load %arg4[%c0_4, %c0_5] : memref<1x64xf32, #tpu.memory_space<vmem>>, vector<1x64xf32>
    %7 = vector.broadcast %6 : vector<1x64xf32> to vector<16x64xf32>
    %8 = arith.addf %5, %7 : vector<16x64xf32>
    %cst_6 = arith.constant 0.000000e+00 : f32
    %9 = vector.broadcast %cst_6 : f32 to vector<16x64xf32>
    %10 = arith.maximumf %8, %9 : vector<16x64xf32>
    %c0_7 = arith.constant 0 : index
    %c0_8 = arith.constant 0 : index
    %11 = vector.load %arg10[%c0_7, %c0_8] : memref<16x32xf32, #tpu.memory_space<vmem>>, vector<16x32xf32>
    %12 = arith.truncf %10 : vector<16x64xf32> to vector<16x64xbf16>
    %c0_9 = arith.constant 0 : index
    %c0_10 = arith.constant 0 : index
    %13 = vector.load %arg5[%c0_9, %c0_10] : memref<64x32xbf16, #tpu.memory_space<vmem>>, vector<64x32xbf16>
    %cst_11 = arith.constant dense<0.000000e+00> : vector<16x32xf32>
    %14 = tpu.matmul %12, %13, %cst_11 {dimension_numbers = #tpu.dot_dimension_numbers<[1], [0], [0], [1], [0, 0, 1, 1], [], []>} : vector<16x64xbf16>, vector<64x32xbf16>, vector<16x32xf32> -> vector<16x32xf32>
    %15 = arith.addf %11, %14 : vector<16x32xf32>
    %c0_12 = arith.constant 0 : index
    %c0_13 = arith.constant 0 : index
    %16 = vector.load %arg10[%c0_12, %c0_13] : memref<16x32xf32, #tpu.memory_space<vmem>>, vector<16x32xf32>
    tpu.vector_store %arg10[%c0_12, %c0_13], %15 {strides = array<i32>} : memref<16x32xf32, #tpu.memory_space<vmem>>, vector<16x32xf32>,
    %c0_i32_14 = arith.constant 0 : i32
    %17 = arith.cmpi eq, %arg1, %c0_i32_14 : i32
    %18 = arith.extui %17 : i1 to i32
    %c0_i32_15 = arith.constant 0 : i32
    %19 = arith.cmpi ne, %18, %c0_i32_15 : i32
    scf.if %19 {
      %c0_16 = arith.constant 0 : index
      %c0_17 = arith.constant 0 : index
      %20 = vector.load %arg10[%c0_16, %c0_17] : memref<16x32xf32, #tpu.memory_space<vmem>>, vector<16x32xf32>
      %c0_18 = arith.constant 0 : index
      %c0_19 = arith.constant 0 : index
      %21 = vector.load %arg6[%c0_18, %c0_19] : memref<1x32xf32, #tpu.memory_space<vmem>>, vector<1x32xf32>
      %22 = vector.broadcast %21 : vector<1x32xf32> to vector<16x32xf32>
      %23 = arith.addf %20, %22 : vector<16x32xf32>
      %c0_20 = arith.constant 0 : index
      %c0_21 = arith.constant 0 : index
      %24 = vector.load %arg2[%c0_20, %c0_21] : memref<16x32xbf16, #tpu.memory_space<vmem>>, vector<16x32xbf16>
      %25 = arith.extf %24 : vector<16x32xbf16> to vector<16x32xf32>
      %26 = arith.addf %23, %25 : vector<16x32xf32>
      %cst_22 = arith.constant dense<0.000000e+00> : vector<16xf32>
      %27 = vector.multi_reduction <add>, %26, %cst_22 [1] : vector<16x32xf32> to vector<16xf32>
      %28 = vector.shape_cast %27 : vector<16xf32> to vector<16x1xf32>
      %cst_23 = arith.constant 3.200000e+01 : f32
      %29 = vector.broadcast %cst_23 : f32 to vector<16x1xf32>
      %30 = arith.divf %28, %29 : vector<16x1xf32>
      %31 = vector.broadcast %30 : vector<16x1xf32> to vector<16x32xf32>
      %32 = arith.subf %26, %31 : vector<16x32xf32>
      %33 = arith.mulf %32, %32 : vector<16x32xf32>
      %cst_24 = arith.constant dense<0.000000e+00> : vector<16xf32>
      %34 = vector.multi_reduction <add>, %33, %cst_24 [1] : vector<16x32xf32> to vector<16xf32>
      %35 = vector.shape_cast %34 : vector<16xf32> to vector<16x1xf32>
      %cst_25 = arith.constant 3.200000e+01 : f32
      %36 = vector.broadcast %cst_25 : f32 to vector<16x1xf32>
      %37 = arith.divf %35, %36 : vector<16x1xf32>
      %38 = vector.broadcast %30 : vector<16x1xf32> to vector<16x32xf32>
      %39 = arith.subf %26, %38 : vector<16x32xf32>
      %cst_26 = arith.constant 9.99999996E-13 : f32
      %40 = vector.broadcast %cst_26 : f32 to vector<16x1xf32>
      %41 = arith.addf %37, %40 : vector<16x1xf32>
      %42 = math.rsqrt %41 : vector<16x1xf32>
      %43 = vector.broadcast %42 : vector<16x1xf32> to vector<16x32xf32>
      %44 = arith.mulf %39, %43 : vector<16x32xf32>
      %c0_27 = arith.constant 0 : index
      %c0_28 = arith.constant 0 : index
      %45 = vector.load %arg7[%c0_27, %c0_28] : memref<1x32xf32, #tpu.memory_space<vmem>>, vector<1x32xf32>
      %46 = vector.broadcast %45 : vector<1x32xf32> to vector<16x32xf32>
      %47 = arith.mulf %44, %46 : vector<16x32xf32>
      %c0_29 = arith.constant 0 : index
      %c0_30 = arith.constant 0 : index
      %48 = vector.load %arg8[%c0_29, %c0_30] : memref<1x32xf32, #tpu.memory_space<vmem>>, vector<1x32xf32>
      %49 = vector.broadcast %48 : vector<1x32xf32> to vector<16x32xf32>
      %50 = arith.addf %47, %49 : vector<16x32xf32>
      %51 = arith.truncf %50 : vector<16x32xf32> to vector<16x32xbf16>
      %c0_31 = arith.constant 0 : index
      %c0_32 = arith.constant 0 : index
      %52 = vector.load %arg9[%c0_31, %c0_32] : memref<16x32xbf16, #tpu.memory_space<vmem>>, vector<16x32xbf16>
      tpu.vector_store %arg9[%c0_31, %c0_32], %51 {strides = array<i32>} : memref<16x32xbf16, #tpu.memory_space<vmem>>, vector<16x32xbf16>,
    } else {
    }
    return
  }
  func.func @transform_0(%arg0: i32, %arg1: i32) -> (i32, i32) {
    %c0_i32 = arith.constant 0 : i32
    %c0_i32_0 = arith.constant 0 : i32
    return %arg0, %c0_i32 : i32, i32
  }
  func.func @transform_1(%arg0: i32, %arg1: i32) -> (i32, i32) {
    %c0_i32 = arith.constant 0 : i32
    %c0_i32_0 = arith.constant 0 : i32
    return %c0_i32, %arg1 : i32, i32
  }
  func.func @transform_2(%arg0: i32, %arg1: i32) -> (i32, i32) {
    %c0_i32 = arith.constant 0 : i32
    %c0_i32_0 = arith.constant 0 : i32
    return %c0_i32, %arg1 : i32, i32
  }
  func.func @transform_3(%arg0: i32, %arg1: i32) -> (i32, i32) {
    %c0_i32 = arith.constant 0 : i32
    %c0_i32_0 = arith.constant 0 : i32
    return %arg1, %c0_i32 : i32, i32
  }
  func.func @transform_4(%arg0: i32, %arg1: i32) -> (i32, i32) {
    %c0_i32 = arith.constant 0 : i32
    %c0_i32_0 = arith.constant 0 : i32
    %c0_i32_1 = arith.constant 0 : i32
    return %c0_i32, %c0_i32_0 : i32, i32
  }
  func.func @transform_5(%arg0: i32, %arg1: i32) -> (i32, i32) {
    %c0_i32 = arith.constant 0 : i32
    %c0_i32_0 = arith.constant 0 : i32
    %c0_i32_1 = arith.constant 0 : i32
    return %c0_i32, %c0_i32_0 : i32, i32
  }
  func.func @transform_6(%arg0: i32, %arg1: i32) -> (i32, i32) {
    %c0_i32 = arith.constant 0 : i32
    %c0_i32_0 = arith.constant 0 : i32
    %c0_i32_1 = arith.constant 0 : i32
    return %c0_i32, %c0_i32_0 : i32, i32
  }
  func.func @transform_7(%arg0: i32, %arg1: i32) -> (i32, i32) {
    %c0_i32 = arith.constant 0 : i32
    %c0_i32_0 = arith.constant 0 : i32
    return %arg0, %c0_i32 : i32, i32
  }
}

module attributes {stable_mosaic.version = 11 : i64} {
  func.func @_linear_kernel(%arg0: i32, %arg1: i32, %arg2: i32, %arg3: memref<16x32xbf16, #tpu.memory_space<vmem>>, %arg4: memref<32x64xbf16, #tpu.memory_space<vmem>>, %arg5: memref<1x64xf32, #tpu.memory_space<vmem>>, %arg6: memref<16x64xbf16, #tpu.memory_space<vmem>>, %arg7: memref<16x64xf32, #tpu.memory_space<vmem>>) attributes {dimension_semantics = [#tpu.dimension_semantics<parallel>, #tpu.dimension_semantics<parallel>, #tpu.dimension_semantics<arbitrary>], iteration_bounds = array<i64: 1, 1, 1>, scalar_prefetch = 0 : i64, scratch_operands = 1 : i64, tpu.core_type = #tpu.core_type<tc>, window_params = [{transform_indices = @transform_0, window_bounds = array<i64: 16, 32>}, {transform_indices = @transform_1, window_bounds = array<i64: 32, 64>}, {transform_indices = @transform_2, window_bounds = array<i64: 1, 64>}, {transform_indices = @transform_3, window_bounds = array<i64: 16, 64>}]} {
    %c0_i32 = arith.constant 0 : i32
    %0 = arith.cmpi eq, %arg2, %c0_i32 : i32
    %1 = arith.extui %0 : i1 to i32
    %c0_i32_0 = arith.constant 0 : i32
    %2 = arith.cmpi ne, %1, %c0_i32_0 : i32
    scf.if %2 {
      %cst_10 = arith.constant 0.000000e+00 : f32
      %12 = vector.broadcast %cst_10 : f32 to vector<16x64xf32>
      %c0_11 = arith.constant 0 : index
      %c0_12 = arith.constant 0 : index
      %13 = vector.load %arg7[%c0_11, %c0_12] : memref<16x64xf32, #tpu.memory_space<vmem>>, vector<16x64xf32>
      tpu.vector_store %arg7[%c0_11, %c0_12], %12 {strides = array<i32>} : memref<16x64xf32, #tpu.memory_space<vmem>>, vector<16x64xf32>,
    } else {
    }
    %c0 = arith.constant 0 : index
    %c0_1 = arith.constant 0 : index
    %3 = vector.load %arg7[%c0, %c0_1] : memref<16x64xf32, #tpu.memory_space<vmem>>, vector<16x64xf32>
    %c0_2 = arith.constant 0 : index
    %c0_3 = arith.constant 0 : index
    %4 = vector.load %arg3[%c0_2, %c0_3] : memref<16x32xbf16, #tpu.memory_space<vmem>>, vector<16x32xbf16>
    %c0_4 = arith.constant 0 : index
    %c0_5 = arith.constant 0 : index
    %5 = vector.load %arg4[%c0_4, %c0_5] : memref<32x64xbf16, #tpu.memory_space<vmem>>, vector<32x64xbf16>
    %cst = arith.constant dense<0.000000e+00> : vector<16x64xf32>
    %6 = tpu.matmul %4, %5, %cst {dimension_numbers = #tpu.dot_dimension_numbers<[1], [0], [0], [1], [0, 0, 1, 1], [], []>} : vector<16x32xbf16>, vector<32x64xbf16>, vector<16x64xf32> -> vector<16x64xf32>
    %7 = arith.addf %3, %6 : vector<16x64xf32>
    %c0_6 = arith.constant 0 : index
    %c0_7 = arith.constant 0 : index
    %8 = vector.load %arg7[%c0_6, %c0_7] : memref<16x64xf32, #tpu.memory_space<vmem>>, vector<16x64xf32>
    tpu.vector_store %arg7[%c0_6, %c0_7], %7 {strides = array<i32>} : memref<16x64xf32, #tpu.memory_space<vmem>>, vector<16x64xf32>,
    %c0_i32_8 = arith.constant 0 : i32
    %9 = arith.cmpi eq, %arg2, %c0_i32_8 : i32
    %10 = arith.extui %9 : i1 to i32
    %c0_i32_9 = arith.constant 0 : i32
    %11 = arith.cmpi ne, %10, %c0_i32_9 : i32
    scf.if %11 {
      %c0_10 = arith.constant 0 : index
      %c0_11 = arith.constant 0 : index
      %12 = vector.load %arg7[%c0_10, %c0_11] : memref<16x64xf32, #tpu.memory_space<vmem>>, vector<16x64xf32>
      %c0_12 = arith.constant 0 : index
      %c0_13 = arith.constant 0 : index
      %13 = vector.load %arg5[%c0_12, %c0_13] : memref<1x64xf32, #tpu.memory_space<vmem>>, vector<1x64xf32>
      %14 = vector.broadcast %13 : vector<1x64xf32> to vector<16x64xf32>
      %15 = arith.addf %12, %14 : vector<16x64xf32>
      %16 = arith.truncf %15 : vector<16x64xf32> to vector<16x64xbf16>
      %c0_14 = arith.constant 0 : index
      %c0_15 = arith.constant 0 : index
      %17 = vector.load %arg6[%c0_14, %c0_15] : memref<16x64xbf16, #tpu.memory_space<vmem>>, vector<16x64xbf16>
      tpu.vector_store %arg6[%c0_14, %c0_15], %16 {strides = array<i32>} : memref<16x64xbf16, #tpu.memory_space<vmem>>, vector<16x64xbf16>,
    } else {
    }
    return
  }
  func.func @transform_0(%arg0: i32, %arg1: i32, %arg2: i32) -> (i32, i32) {
    %c0_i32 = arith.constant 0 : i32
    return %arg0, %arg2 : i32, i32
  }
  func.func @transform_1(%arg0: i32, %arg1: i32, %arg2: i32) -> (i32, i32) {
    %c0_i32 = arith.constant 0 : i32
    return %arg2, %arg1 : i32, i32
  }
  func.func @transform_2(%arg0: i32, %arg1: i32, %arg2: i32) -> (i32, i32) {
    %c0_i32 = arith.constant 0 : i32
    %c0_i32_0 = arith.constant 0 : i32
    return %c0_i32, %arg1 : i32, i32
  }
  func.func @transform_3(%arg0: i32, %arg1: i32, %arg2: i32) -> (i32, i32) {
    %c0_i32 = arith.constant 0 : i32
    return %arg0, %arg1 : i32, i32
  }
}

module attributes {stable_mosaic.version = 11 : i64} {
  func.func @_linear_kernel(%arg0: i32, %arg1: i32, %arg2: i32, %arg3: memref<16x32xbf16, #tpu.memory_space<vmem>>, %arg4: memref<32x32xbf16, #tpu.memory_space<vmem>>, %arg5: memref<1x32xf32, #tpu.memory_space<vmem>>, %arg6: memref<16x32xbf16, #tpu.memory_space<vmem>>, %arg7: memref<16x32xf32, #tpu.memory_space<vmem>>) attributes {dimension_semantics = [#tpu.dimension_semantics<parallel>, #tpu.dimension_semantics<parallel>, #tpu.dimension_semantics<arbitrary>], iteration_bounds = array<i64: 1, 1, 1>, scalar_prefetch = 0 : i64, scratch_operands = 1 : i64, tpu.core_type = #tpu.core_type<tc>, window_params = [{transform_indices = @transform_0, window_bounds = array<i64: 16, 32>}, {transform_indices = @transform_1, window_bounds = array<i64: 32, 32>}, {transform_indices = @transform_2, window_bounds = array<i64: 1, 32>}, {transform_indices = @transform_3, window_bounds = array<i64: 16, 32>}]} {
    %c0_i32 = arith.constant 0 : i32
    %0 = arith.cmpi eq, %arg2, %c0_i32 : i32
    %1 = arith.extui %0 : i1 to i32
    %c0_i32_0 = arith.constant 0 : i32
    %2 = arith.cmpi ne, %1, %c0_i32_0 : i32
    scf.if %2 {
      %cst_10 = arith.constant 0.000000e+00 : f32
      %12 = vector.broadcast %cst_10 : f32 to vector<16x32xf32>
      %c0_11 = arith.constant 0 : index
      %c0_12 = arith.constant 0 : index
      %13 = vector.load %arg7[%c0_11, %c0_12] : memref<16x32xf32, #tpu.memory_space<vmem>>, vector<16x32xf32>
      tpu.vector_store %arg7[%c0_11, %c0_12], %12 {strides = array<i32>} : memref<16x32xf32, #tpu.memory_space<vmem>>, vector<16x32xf32>,
    } else {
    }
    %c0 = arith.constant 0 : index
    %c0_1 = arith.constant 0 : index
    %3 = vector.load %arg7[%c0, %c0_1] : memref<16x32xf32, #tpu.memory_space<vmem>>, vector<16x32xf32>
    %c0_2 = arith.constant 0 : index
    %c0_3 = arith.constant 0 : index
    %4 = vector.load %arg3[%c0_2, %c0_3] : memref<16x32xbf16, #tpu.memory_space<vmem>>, vector<16x32xbf16>
    %c0_4 = arith.constant 0 : index
    %c0_5 = arith.constant 0 : index
    %5 = vector.load %arg4[%c0_4, %c0_5] : memref<32x32xbf16, #tpu.memory_space<vmem>>, vector<32x32xbf16>
    %cst = arith.constant dense<0.000000e+00> : vector<16x32xf32>
    %6 = tpu.matmul %4, %5, %cst {dimension_numbers = #tpu.dot_dimension_numbers<[1], [0], [0], [1], [0, 0, 1, 1], [], []>} : vector<16x32xbf16>, vector<32x32xbf16>, vector<16x32xf32> -> vector<16x32xf32>
    %7 = arith.addf %3, %6 : vector<16x32xf32>
    %c0_6 = arith.constant 0 : index
    %c0_7 = arith.constant 0 : index
    %8 = vector.load %arg7[%c0_6, %c0_7] : memref<16x32xf32, #tpu.memory_space<vmem>>, vector<16x32xf32>
    tpu.vector_store %arg7[%c0_6, %c0_7], %7 {strides = array<i32>} : memref<16x32xf32, #tpu.memory_space<vmem>>, vector<16x32xf32>,
    %c0_i32_8 = arith.constant 0 : i32
    %9 = arith.cmpi eq, %arg2, %c0_i32_8 : i32
    %10 = arith.extui %9 : i1 to i32
    %c0_i32_9 = arith.constant 0 : i32
    %11 = arith.cmpi ne, %10, %c0_i32_9 : i32
    scf.if %11 {
      %c0_10 = arith.constant 0 : index
      %c0_11 = arith.constant 0 : index
      %12 = vector.load %arg7[%c0_10, %c0_11] : memref<16x32xf32, #tpu.memory_space<vmem>>, vector<16x32xf32>
      %c0_12 = arith.constant 0 : index
      %c0_13 = arith.constant 0 : index
      %13 = vector.load %arg5[%c0_12, %c0_13] : memref<1x32xf32, #tpu.memory_space<vmem>>, vector<1x32xf32>
      %14 = vector.broadcast %13 : vector<1x32xf32> to vector<16x32xf32>
      %15 = arith.addf %12, %14 : vector<16x32xf32>
      %16 = arith.truncf %15 : vector<16x32xf32> to vector<16x32xbf16>
      %c0_14 = arith.constant 0 : index
      %c0_15 = arith.constant 0 : index
      %17 = vector.load %arg6[%c0_14, %c0_15] : memref<16x32xbf16, #tpu.memory_space<vmem>>, vector<16x32xbf16>
      tpu.vector_store %arg6[%c0_14, %c0_15], %16 {strides = array<i32>} : memref<16x32xbf16, #tpu.memory_space<vmem>>, vector<16x32xbf16>,
    } else {
    }
    return
  }
  func.func @transform_0(%arg0: i32, %arg1: i32, %arg2: i32) -> (i32, i32) {
    %c0_i32 = arith.constant 0 : i32
    return %arg0, %arg2 : i32, i32
  }
  func.func @transform_1(%arg0: i32, %arg1: i32, %arg2: i32) -> (i32, i32) {
    %c0_i32 = arith.constant 0 : i32
    return %arg2, %arg1 : i32, i32
  }
  func.func @transform_2(%arg0: i32, %arg1: i32, %arg2: i32) -> (i32, i32) {
    %c0_i32 = arith.constant 0 : i32
    %c0_i32_0 = arith.constant 0 : i32
    return %c0_i32, %arg1 : i32, i32
  }
  func.func @transform_3(%arg0: i32, %arg1: i32, %arg2: i32) -> (i32, i32) {
    %c0_i32 = arith.constant 0 : i32
    return %arg0, %arg1 : i32, i32
  }
}

module attributes {stable_mosaic.version = 11 : i64} {
  func.func @_mha_cross_kernel(%arg0: i32, %arg1: memref<1x8x32xbf16, #tpu.memory_space<vmem>>, %arg2: memref<1x8x64xbf16, #tpu.memory_space<vmem>>, %arg3: memref<1x8x8xbf16, #tpu.memory_space<vmem>>, %arg4: memref<1x8x32xbf16, #tpu.memory_space<vmem>>) attributes {dimension_semantics = [#tpu.dimension_semantics<parallel>], iteration_bounds = array<i64: 2>, scalar_prefetch = 0 : i64, scratch_operands = 0 : i64, tpu.core_type = #tpu.core_type<tc>, window_params = [{transform_indices = @transform_0, window_bounds = array<i64: 1, 8, 32>}, {transform_indices = @transform_1, window_bounds = array<i64: 1, 8, 64>}, {transform_indices = @transform_2, window_bounds = array<i64: 1, 8, 8>}, {transform_indices = @transform_3, window_bounds = array<i64: 1, 8, 32>}]} {
    %c0 = arith.constant 0 : index
    %c0_0 = arith.constant 0 : index
    %c0_1 = arith.constant 0 : index
    %0 = vector.load %arg1[%c0, %c0_0, %c0_1] : memref<1x8x32xbf16, #tpu.memory_space<vmem>>, vector<1x8x32xbf16>
    %1 = vector.shape_cast %0 : vector<1x8x32xbf16> to vector<8x32xbf16>
    %cst = arith.constant 3.535160e-01 : bf16
    %2 = vector.broadcast %cst : bf16 to vector<8x32xbf16>
    %3 = arith.mulf %1, %2 : vector<8x32xbf16>
    %c0_2 = arith.constant 0 : index
    %c0_3 = arith.constant 0 : index
    %c0_4 = arith.constant 0 : index
    %4 = vector.load %arg2[%c0_2, %c0_3, %c0_4] : memref<1x8x64xbf16, #tpu.memory_space<vmem>>, vector<1x8x64xbf16>
    %5 = vector.shape_cast %4 : vector<1x8x64xbf16> to vector<8x64xbf16>
    %6 = vector.extract_strided_slice %5 {offsets = [0, 0], sizes = [8, 32], strides = [1, 1]} : vector<8x64xbf16> to vector<8x32xbf16>
    %7 = vector.extract_strided_slice %5 {offsets = [0, 32], sizes = [8, 32], strides = [1, 1]} : vector<8x64xbf16> to vector<8x32xbf16>
    %c0_5 = arith.constant 0 : index
    %c0_6 = arith.constant 0 : index
    %c0_7 = arith.constant 0 : index
    %8 = vector.load %arg3[%c0_5, %c0_6, %c0_7] : memref<1x8x8xbf16, #tpu.memory_space<vmem>>, vector<1x8x8xbf16>
    %9 = vector.shape_cast %8 : vector<1x8x8xbf16> to vector<8x8xbf16>
    %cst_8 = arith.constant 0.000000e+00 : bf16
    %10 = vector.broadcast %cst_8 : bf16 to vector<8x8xbf16>
    %11 = arith.cmpf ogt, %9, %10 : vector<8x8xbf16>
    %12 = vector.extract_strided_slice %3 {offsets = [0, 0], sizes = [8, 8], strides = [1, 1]} : vector<8x32xbf16> to vector<8x8xbf16>
    %13 = vector.extract_strided_slice %3 {offsets = [0, 8], sizes = [8, 8], strides = [1, 1]} : vector<8x32xbf16> to vector<8x8xbf16>
    %14 = vector.extract_strided_slice %3 {offsets = [0, 16], sizes = [8, 8], strides = [1, 1]} : vector<8x32xbf16> to vector<8x8xbf16>
    %15 = vector.extract_strided_slice %3 {offsets = [0, 24], sizes = [8, 8], strides = [1, 1]} : vector<8x32xbf16> to vector<8x8xbf16>
    %16 = vector.shape_cast %12 : vector<8x8xbf16> to vector<1x8x8xbf16>
    %17 = vector.shape_cast %13 : vector<8x8xbf16> to vector<1x8x8xbf16>
    %18 = vector.shape_cast %14 : vector<8x8xbf16> to vector<1x8x8xbf16>
    %19 = vector.shape_cast %15 : vector<8x8xbf16> to vector<1x8x8xbf16>
    %20 = tpu.concatenate %16, %17, %18, %19 in 0 : vector<1x8x8xbf16>, vector<1x8x8xbf16>, vector<1x8x8xbf16>, vector<1x8x8xbf16> -> vector<4x8x8xbf16>
    %21 = vector.extract_strided_slice %6 {offsets = [0, 0], sizes = [8, 8], strides = [1, 1]} : vector<8x32xbf16> to vector<8x8xbf16>
    %22 = vector.extract_strided_slice %6 {offsets = [0, 8], sizes = [8, 8], strides = [1, 1]} : vector<8x32xbf16> to vector<8x8xbf16>
    %23 = vector.extract_strided_slice %6 {offsets = [0, 16], sizes = [8, 8], strides = [1, 1]} : vector<8x32xbf16> to vector<8x8xbf16>
    %24 = vector.extract_strided_slice %6 {offsets = [0, 24], sizes = [8, 8], strides = [1, 1]} : vector<8x32xbf16> to vector<8x8xbf16>
    %25 = vector.shape_cast %21 : vector<8x8xbf16> to vector<1x8x8xbf16>
    %26 = vector.shape_cast %22 : vector<8x8xbf16> to vector<1x8x8xbf16>
    %27 = vector.shape_cast %23 : vector<8x8xbf16> to vector<1x8x8xbf16>
    %28 = vector.shape_cast %24 : vector<8x8xbf16> to vector<1x8x8xbf16>
    %29 = tpu.concatenate %25, %26, %27, %28 in 0 : vector<1x8x8xbf16>, vector<1x8x8xbf16>, vector<1x8x8xbf16>, vector<1x8x8xbf16> -> vector<4x8x8xbf16>
    %30 = vector.extract_strided_slice %7 {offsets = [0, 0], sizes = [8, 8], strides = [1, 1]} : vector<8x32xbf16> to vector<8x8xbf16>
    %31 = vector.extract_strided_slice %7 {offsets = [0, 8], sizes = [8, 8], strides = [1, 1]} : vector<8x32xbf16> to vector<8x8xbf16>
    %32 = vector.extract_strided_slice %7 {offsets = [0, 16], sizes = [8, 8], strides = [1, 1]} : vector<8x32xbf16> to vector<8x8xbf16>
    %33 = vector.extract_strided_slice %7 {offsets = [0, 24], sizes = [8, 8], strides = [1, 1]} : vector<8x32xbf16> to vector<8x8xbf16>
    %34 = vector.shape_cast %30 : vector<8x8xbf16> to vector<1x8x8xbf16>
    %35 = vector.shape_cast %31 : vector<8x8xbf16> to vector<1x8x8xbf16>
    %36 = vector.shape_cast %32 : vector<8x8xbf16> to vector<1x8x8xbf16>
    %37 = vector.shape_cast %33 : vector<8x8xbf16> to vector<1x8x8xbf16>
    %38 = tpu.concatenate %34, %35, %36, %37 in 0 : vector<1x8x8xbf16>, vector<1x8x8xbf16>, vector<1x8x8xbf16>, vector<1x8x8xbf16> -> vector<4x8x8xbf16>
    %cst_9 = arith.constant dense<0.000000e+00> : vector<4x8x8xf32>
    %39 = tpu.matmul %20, %29, %cst_9 {dimension_numbers = #tpu.dot_dimension_numbers<[2], [2], [1], [1], [0, 0, 0, 1, 1, 1], [0], [0]>} : vector<4x8x8xbf16>, vector<4x8x8xbf16>, vector<4x8x8xf32> -> vector<4x8x8xf32>
    %40 = vector.shape_cast %11 : vector<8x8xi1> to vector<1x8x8xi1>
    %cst_10 = arith.constant -1.000000e+04 : f32
    %41 = vector.shape_cast %40 : vector<1x8x8xi1> to vector<1x8x8xi1>
    %42 = vector.broadcast %41 : vector<1x8x8xi1> to vector<4x8x8xi1>
    %43 = vector.broadcast %cst_10 : f32 to vector<4x8x8xf32>
    %44 = arith.select %42, %39, %43 : vector<4x8x8xi1>, vector<4x8x8xf32>
    %cst_11 = arith.constant dense<0xFF800000> : vector<4x8xf32>
    %45 = vector.multi_reduction <maximumf>, %44, %cst_11 [2] : vector<4x8x8xf32> to vector<4x8xf32>
    %46 = vector.shape_cast %45 : vector<4x8xf32> to vector<4x8x1xf32>
    %47 = vector.broadcast %46 : vector<4x8x1xf32> to vector<4x8x8xf32>
    %48 = arith.subf %44, %47 : vector<4x8x8xf32>
    %49 = math.exp %48 : vector<4x8x8xf32>
    %cst_12 = arith.constant dense<0.000000e+00> : vector<4x8xf32>
    %50 = vector.multi_reduction <add>, %49, %cst_12 [2] : vector<4x8x8xf32> to vector<4x8xf32>
    %51 = vector.shape_cast %50 : vector<4x8xf32> to vector<4x8x1xf32>
    %52 = tpu.reciprocal %51 {approx = true} : vector<4x8x1xf32> -> vector<4x8x1xf32>
    %53 = vector.broadcast %52 : vector<4x8x1xf32> to vector<4x8x8xf32>
    %54 = arith.mulf %49, %53 : vector<4x8x8xf32>
    %55 = arith.truncf %54 : vector<4x8x8xf32> to vector<4x8x8xbf16>
    %cst_13 = arith.constant dense<0.000000e+00> : vector<4x8x8xf32>
    %56 = tpu.matmul %55, %38, %cst_13 {dimension_numbers = #tpu.dot_dimension_numbers<[2], [1], [1], [2], [0, 0, 0, 1, 1, 2], [0], [0]>} : vector<4x8x8xbf16>, vector<4x8x8xbf16>, vector<4x8x8xf32> -> vector<4x8x8xf32>
    %57 = vector.extract_strided_slice %56 {offsets = [0, 0, 0], sizes = [1, 8, 8], strides = [1, 1, 1]} : vector<4x8x8xf32> to vector<1x8x8xf32>
    %58 = vector.shape_cast %57 : vector<1x8x8xf32> to vector<8x8xf32>
    %59 = vector.extract_strided_slice %56 {offsets = [1, 0, 0], sizes = [1, 8, 8], strides = [1, 1, 1]} : vector<4x8x8xf32> to vector<1x8x8xf32>
    %60 = vector.shape_cast %59 : vector<1x8x8xf32> to vector<8x8xf32>
    %61 = vector.extract_strided_slice %56 {offsets = [2, 0, 0], sizes = [1, 8, 8], strides = [1, 1, 1]} : vector<4x8x8xf32> to vector<1x8x8xf32>
    %62 = vector.shape_cast %61 : vector<1x8x8xf32> to vector<8x8xf32>
    %63 = vector.extract_strided_slice %56 {offsets = [3, 0, 0], sizes = [1, 8, 8], strides = [1, 1, 1]} : vector<4x8x8xf32> to vector<1x8x8xf32>
    %64 = vector.shape_cast %63 : vector<1x8x8xf32> to vector<8x8xf32>
    %65 = tpu.concatenate %58, %60, %62, %64 in 1 : vector<8x8xf32>, vector<8x8xf32>, vector<8x8xf32>, vector<8x8xf32> -> vector<8x32xf32>
    %66 = arith.truncf %65 : vector<8x32xf32> to vector<8x32xbf16>
    %c0_14 = arith.constant 0 : index
    %c0_15 = arith.constant 0 : index
    %c0_16 = arith.constant 0 : index
    %67 = vector.load %arg4[%c0_14, %c0_15, %c0_16] : memref<1x8x32xbf16, #tpu.memory_space<vmem>>, vector<1x8x32xbf16>
    %68 = vector.shape_cast %67 : vector<1x8x32xbf16> to vector<8x32xbf16>
    %69 = vector.shape_cast %66 : vector<8x32xbf16> to vector<1x8x32xbf16>
    tpu.vector_store %arg4[%c0_14, %c0_15, %c0_16], %69 {strides = array<i32>} : memref<1x8x32xbf16, #tpu.memory_space<vmem>>, vector<1x8x32xbf16>,
    return
  }
  func.func @transform_0(%arg0: i32) -> (i32, i32, i32) {
    %c0_i32 = arith.constant 0 : i32
    %c0_i32_0 = arith.constant 0 : i32
    %c0_i32_1 = arith.constant 0 : i32
    return %arg0, %c0_i32, %c0_i32_0 : i32, i32, i32
  }
  func.func @transform_1(%arg0: i32) -> (i32, i32, i32) {
    %c0_i32 = arith.constant 0 : i32
    %c0_i32_0 = arith.constant 0 : i32
    %c0_i32_1 = arith.constant 0 : i32
    return %arg0, %c0_i32, %c0_i32_0 : i32, i32, i32
  }
  func.func @transform_2(%arg0: i32) -> (i32, i32, i32) {
    %c0_i32 = arith.constant 0 : i32
    %c0_i32_0 = arith.constant 0 : i32
    %c0_i32_1 = arith.constant 0 : i32
    return %arg0, %c0_i32, %c0_i32_0 : i32, i32, i32
  }
  func.func @transform_3(%arg0: i32) -> (i32, i32, i32) {
    %c0_i32 = arith.constant 0 : i32
    %c0_i32_0 = arith.constant 0 : i32
    %c0_i32_1 = arith.constant 0 : i32
    return %arg0, %c0_i32, %c0_i32_0 : i32, i32, i32
  }
}

module attributes {stable_mosaic.version = 11 : i64} {
  func.func @_linear_kernel(%arg0: i32, %arg1: i32, %arg2: i32, %arg3: memref<16x32xbf16, #tpu.memory_space<vmem>>, %arg4: memref<32x20xbf16, #tpu.memory_space<vmem>>, %arg5: memref<1x20xf32, #tpu.memory_space<vmem>>, %arg6: memref<16x20xf32, #tpu.memory_space<vmem>>, %arg7: memref<16x20xf32, #tpu.memory_space<vmem>>) attributes {dimension_semantics = [#tpu.dimension_semantics<parallel>, #tpu.dimension_semantics<parallel>, #tpu.dimension_semantics<arbitrary>], iteration_bounds = array<i64: 1, 1, 1>, scalar_prefetch = 0 : i64, scratch_operands = 1 : i64, tpu.core_type = #tpu.core_type<tc>, window_params = [{transform_indices = @transform_0, window_bounds = array<i64: 16, 32>}, {transform_indices = @transform_1, window_bounds = array<i64: 32, 20>}, {transform_indices = @transform_2, window_bounds = array<i64: 1, 20>}, {transform_indices = @transform_3, window_bounds = array<i64: 16, 20>}]} {
    %c0_i32 = arith.constant 0 : i32
    %0 = arith.cmpi eq, %arg2, %c0_i32 : i32
    %1 = arith.extui %0 : i1 to i32
    %c0_i32_0 = arith.constant 0 : i32
    %2 = arith.cmpi ne, %1, %c0_i32_0 : i32
    scf.if %2 {
      %cst_10 = arith.constant 0.000000e+00 : f32
      %12 = vector.broadcast %cst_10 : f32 to vector<16x20xf32>
      %c0_11 = arith.constant 0 : index
      %c0_12 = arith.constant 0 : index
      %13 = vector.load %arg7[%c0_11, %c0_12] : memref<16x20xf32, #tpu.memory_space<vmem>>, vector<16x20xf32>
      tpu.vector_store %arg7[%c0_11, %c0_12], %12 {strides = array<i32>} : memref<16x20xf32, #tpu.memory_space<vmem>>, vector<16x20xf32>,
    } else {
    }
    %c0 = arith.constant 0 : index
    %c0_1 = arith.constant 0 : index
    %3 = vector.load %arg7[%c0, %c0_1] : memref<16x20xf32, #tpu.memory_space<vmem>>, vector<16x20xf32>
    %c0_2 = arith.constant 0 : index
    %c0_3 = arith.constant 0 : index
    %4 = vector.load %arg3[%c0_2, %c0_3] : memref<16x32xbf16, #tpu.memory_space<vmem>>, vector<16x32xbf16>
    %c0_4 = arith.constant 0 : index
    %c0_5 = arith.constant 0 : index
    %5 = vector.load %arg4[%c0_4, %c0_5] : memref<32x20xbf16, #tpu.memory_space<vmem>>, vector<32x20xbf16>
    %cst = arith.constant dense<0.000000e+00> : vector<16x20xf32>
    %6 = tpu.matmul %4, %5, %cst {dimension_numbers = #tpu.dot_dimension_numbers<[1], [0], [0], [1], [0, 0, 1, 1], [], []>} : vector<16x32xbf16>, vector<32x20xbf16>, vector<16x20xf32> -> vector<16x20xf32>
    %7 = arith.addf %3, %6 : vector<16x20xf32>
    %c0_6 = arith.constant 0 : index
    %c0_7 = arith.constant 0 : index
    %8 = vector.load %arg7[%c0_6, %c0_7] : memref<16x20xf32, #tpu.memory_space<vmem>>, vector<16x20xf32>
    tpu.vector_store %arg7[%c0_6, %c0_7], %7 {strides = array<i32>} : memref<16x20xf32, #tpu.memory_space<vmem>>, vector<16x20xf32>,
    %c0_i32_8 = arith.constant 0 : i32
    %9 = arith.cmpi eq, %arg2, %c0_i32_8 : i32
    %10 = arith.extui %9 : i1 to i32
    %c0_i32_9 = arith.constant 0 : i32
    %11 = arith.cmpi ne, %10, %c0_i32_9 : i32
    scf.if %11 {
      %c0_10 = arith.constant 0 : index
      %c0_11 = arith.constant 0 : index
      %12 = vector.load %arg7[%c0_10, %c0_11] : memref<16x20xf32, #tpu.memory_space<vmem>>, vector<16x20xf32>
      %c0_12 = arith.constant 0 : index
      %c0_13 = arith.constant 0 : index
      %13 = vector.load %arg5[%c0_12, %c0_13] : memref<1x20xf32, #tpu.memory_space<vmem>>, vector<1x20xf32>
      %14 = vector.broadcast %13 : vector<1x20xf32> to vector<16x20xf32>
      %15 = arith.addf %12, %14 : vector<16x20xf32>
      %c0_14 = arith.constant 0 : index
      %c0_15 = arith.constant 0 : index
      %16 = vector.load %arg6[%c0_14, %c0_15] : memref<16x20xf32, #tpu.memory_space<vmem>>, vector<16x20xf32>
      tpu.vector_store %arg6[%c0_14, %c0_15], %15 {strides = array<i32>} : memref<16x20xf32, #tpu.memory_space<vmem>>, vector<16x20xf32>,
    } else {
    }
    return
  }
  func.func @transform_0(%arg0: i32, %arg1: i32, %arg2: i32) -> (i32, i32) {
    %c0_i32 = arith.constant 0 : i32
    return %arg0, %arg2 : i32, i32
  }
  func.func @transform_1(%arg0: i32, %arg1: i32, %arg2: i32) -> (i32, i32) {
    %c0_i32 = arith.constant 0 : i32
    return %arg2, %arg1 : i32, i32
  }
  func.func @transform_2(%arg0: i32, %arg1: i32, %arg2: i32) -> (i32, i32) {
    %c0_i32 = arith.constant 0 : i32
    %c0_i32_0 = arith.constant 0 : i32
    return %c0_i32, %arg1 : i32, i32
  }
  func.func @transform_3(%arg0: i32, %arg1: i32, %arg2: i32) -> (i32, i32) {
    %c0_i32 = arith.constant 0 : i32
    return %arg0, %arg1 : i32, i32
  }
}

</mosaic_0001>

<bundles_post_ra>
// kernel: _lambda_.27
= control target key start
LH: loop header
LB: loop body
LE: loop exit
PB: predicated region body
PF: predicated region fallthrough
CT: control target
= control target key end

     0   :  { %vm28_vm0 = vcmask 261120   ;;  %v220_v0 = vmov 0.0   ;;  %vm221_vm1 = vmmov 0   ;;  %vm178_vm2 = vcmask 257024   ;;  %s293_s1 = inlined_call_operand.vmem [shape: bf16[32,32], index: 1, kind: input, shape index: {}]   ;;  %s294_s0 = inlined_call_operand.vmem [shape: bf16[16,32], index: 0, kind: input, shape index: {}]   ;;  %s295_s3 = inlined_call_operand.vmem [shape: bf16[16,32], index: 3, kind: input, shape index: {}]   ;;  %s296_s2 = inlined_call_operand.vmem [shape: f32[1,32], index: 2, kind: input, shape index: {}]   ;;  %s297_s4 = inlined_call_operand.vmem [shape: f32[1,32], index: 4, kind: input, shape index: {}]   ;;  %s298_s5 = inlined_call_operand.vmem [shape: f32[1,32], index: 5, kind: input, shape index: {}]   ;;  %s299_s6 = inlined_call_operand.vmem [shape: bf16[16,32], index: 6, kind: output, shape index: {}]  }
   0x1   :  { %203 = vmatprep.subr.bf16.mxu0 %v220_v0  ;;  %v213_v1 = vld [vmem:[%s293_s1] sm:$0xff]   ;;  %207 = vmatprep.mubr.msk.bf16.mxu0 %vm221_vm1, %v220_v0  ;;  %29 = vst.msk [vmem:[#allocation2] sm:$0xff] %vm28_vm0, %v220_v0  ;;  %30 = vst.msk [vmem:[#allocation2 + $0x8] sm:$0xff] %vm28_vm0, %v220_v0  ;;  %v214_v2 = vld [vmem:[%s293_s1 + $0x8] sm:$0xff]  }
   0x2   :  { %204 = vmatpush3.bf16.msra.mxu0 %v213_v1  ;;  %v215_v3 = vld [vmem:[%s294_s0] sm:$0xff]  }
   0x3   :  { %205 = vmatprep.subr.bf16.mxu0 %v220_v0  ;;  %v197_v12 = vld [vmem:[%s295_s3] sm:$0xff]  }
   0x4   :  { %v189_v13 = vld [vmem:[%s296_s2] ss:$0 sm:$0xff]  ;;  %v198_v14 = vunpack.c.l.bf16 %v197_v12  ;;  %v199_v17 = vunpack.c.h.bf16 %v197_v12 }
   0x5   :  { %v190_v41 = vld [vmem:[%s297_s4] ss:$0 sm:$0xff] }
   0x6   :  { %206 = vmatpush3.bf16.msra.mxu0 %v214_v2  ;;  %v191_v43 = vld [vmem:[%s298_s5] ss:$0 sm:$0xff] }
   0x8   :  { %v31_v4 = vld [vmem:[#allocation2] sm:$0xff]  ;;  %v32_v6 = vld [vmem:[#allocation2 + $0x8] sm:$0xff] }
   0x9   :  { %208 = vmatmul.mubr.msk.bf16.vlgmr.msra.gmra.mrb[0].mxu0 %vm28_vm0, %v215_v3 }
  0xdc   :  { %v94_v5 = vpop.f32.mrb[0].mxu0 }
  0xdd   :  { %v101_v7 = vadd.f32 %v94_v5, %v31_v4  ;;  %v209_v8 = vpop.f32.mrb[1].mxu0 }
  0xde   :  { %v97_v9 = vpop.f32.mrb[2].mxu0 }
  0xdf   :  { %103 = vst.msk [vmem:[#allocation2] sm:$0xff] %vm28_vm0, %v101_v7  ;;  %v102_v10 = vadd.f32 %v97_v9, %v32_v6  ;;  %v210_v11 = vpop.f32.mrb[3].mxu0 }
  0xe1   :  { %104 = vst.msk [vmem:[#allocation2 + $0x8] sm:$0xff] %vm28_vm0, %v102_v10 }
  0xe6   :  { %v108_v15 = vld [vmem:[#allocation2] sm:$0xff] }
  0xe7   :  { %v117_v16 = vadd.f32 %v189_v13, %v108_v15 }
  0xe8   :  { %v109_v18 = vld [vmem:[#allocation2 + $0x8] sm:$0xff] }
  0xe9   :  { %v123_v19 = vadd.f32 %v198_v14, %v117_v16  ;;  %v118_v20 = vadd.f32 %v189_v13, %v109_v18 }
  0xeb   :  { %v125_v21 = vsel %vm28_vm0, %v123_v19, 0.0  ;;  %v124_v22 = vadd.f32 %v199_v17, %v118_v20 }
  0xec   :  { %126 = vadd.xlane.f32.xlu0 %v125_v21 }
  0xed   :  { %v128_v23 = vsel %vm28_vm0, %v124_v22, 0.0 }
  0xf0   :  { %129 = vadd.xlane.f32.xlu0 %v128_v23 }
 0x179   :  { %v127_v24 = vpop.xlane.xlu0 %126 }
 0x17a   :  { %v132_v25 = vmul.f32 0.03125, %v127_v24 }
 0x17c   :  { %v134_v26 = vsub.f32 %v123_v19, %v132_v25 }
 0x17d   :  { %v130_v27 = vpop.xlane.xlu0 %129 }
 0x17e   :  { %v133_v28 = vmul.f32 0.03125, %v130_v27  ;;  %v136_v29 = vmul.f32 %v134_v26, %v134_v26 }
 0x180   :  { %v135_v30 = vsub.f32 %v124_v22, %v133_v28  ;;  %v138_v31 = vsel %vm28_vm0, %v136_v29, 0.0 }
 0x181   :  { %139 = vadd.xlane.f32.xlu1 %v138_v31 }
 0x182   :  { %v137_v32 = vmul.f32 %v135_v30, %v135_v30 }
 0x184   :  { %v141_v33 = vsel %vm28_vm0, %v137_v32, 0.0 }
 0x185   :  { %142 = vadd.xlane.f32.xlu1 %v141_v33 }
 0x20e   :  { %v140_v34 = vpop.xlane.xlu1 %139 }
 0x20f   :  { %v144_v35 = vmul.f32 0.03125, %v140_v34 }
 0x211   :  { %v146_v36 = vadd.f32 1e-12, %v144_v35 }
 0x212   :  { %v143_v37 = vpop.xlane.xlu1 %142 }
 0x213   :  { %216 = vrsqrt.f32 %v146_v36  ;;  %v145_v38 = vmul.f32 0.03125, %v143_v37 }
 0x215   :  { %v147_v39 = vadd.f32 1e-12, %v145_v38 }
 0x217   :  { %218 = vrsqrt.f32 %v147_v39 }
 0x21d   :  { %v217_v40 = vpop.eup %216 }
 0x21e   :  { %v150_v42 = vmul.f32 %v217_v40, %v134_v26 }
 0x220   :  { %v159_v44 = vmul.f32 %v190_v41, %v150_v42 }
 0x221   :  { %v219_v45 = vpop.eup %218 }
 0x222   :  { %v168_v46 = vadd.f32 %v191_v43, %v159_v44  ;;  %v151_v47 = vmul.f32 %v219_v45, %v135_v30 }
 0x224   :  { %v194_v48 = vpack.c.bf16 %v168_v46, %v168_v46  ;;  %v160_v49 = vmul.f32 %v190_v41, %v151_v47 }
 0x226   :  { %179 = vst.msk [vmem:[%s299_s6] sm:$0xf] %vm178_vm2, %v194_v48  ;;  %v169_v50 = vadd.f32 %v191_v43, %v160_v49 }
 0x228   :  { %v195_v51 = vpack.c.bf16 %v169_v50, %v169_v50 }
 0x22a   :  { %180 = vst.msk [vmem:[%s299_s6 + $0x4] sm:$0xf] %vm178_vm2, %v195_v51 }

// kernel: _lambda_.25
= control target key start
LH: loop header
LB: loop body
LE: loop exit
PB: predicated region body
PF: predicated region fallthrough
CT: control target
= control target key end

     0   :  { %vm19_vm0 = vcmask 785408   ;;  %v151_v0 = vmov 0.0   ;;  %vm152_vm1 = vmmov 0   ;;  %vm47_vm2 = vcmask 261120   ;;  %s195_s1 = inlined_call_operand.vmem [shape: bf16[32,96], index: 1, kind: input, shape index: {}]   ;;  %s196_s0 = inlined_call_operand.vmem [shape: bf16[16,32], index: 0, kind: input, shape index: {}]   ;;  %s197_s2 = inlined_call_operand.vmem [shape: f32[1,96], index: 2, kind: input, shape index: {}]   ;;  %s198_s3 = inlined_call_operand.vmem [shape: bf16[16,96], index: 3, kind: output, shape index: {}]  }
   0x1   :  { %138 = vmatprep.subr.bf16.mxu0 %v151_v0  ;;  %v148_v1 = vld [vmem:[%s195_s1] sm:$0xff]   ;;  %142 = vmatprep.mubr.msk.bf16.mxu0 %vm152_vm1, %v151_v0  ;;  %20 = vst.msk [vmem:[#allocation2] sm:$0xff] %vm19_vm0, %v151_v0  ;;  %21 = vst.msk [vmem:[#allocation2 + $0x8] sm:$0xff] %vm19_vm0, %v151_v0  ;;  %v149_v2 = vld [vmem:[%s195_s1 + $0x8] sm:$0xff]   ;;  %vm119_vm3 = vcmask 781312  }
   0x2   :  { %139 = vmatpush3.bf16.msra.mxu0 %v148_v1  ;;  %v150_v3 = vld [vmem:[%s196_s0] sm:$0xff]  }
   0x3   :  { %140 = vmatprep.subr.bf16.mxu0 %v151_v0  ;;  %v130_v12 = vld [vmem:[%s197_s2] ss:$0 sm:$0xff] }
   0x6   :  { %141 = vmatpush3.bf16.msra.mxu0 %v149_v2 }
   0x8   :  { %v22_v4 = vld [vmem:[#allocation2] sm:$0xff]  ;;  %v23_v6 = vld [vmem:[#allocation2 + $0x8] sm:$0xff] }
   0x9   :  { %143 = vmatmul.mubr.msk.bf16.vlgmr.msra.gmra.mrb[0].mxu0 %vm47_vm2, %v150_v3 }
  0xdc   :  { %v85_v5 = vpop.f32.mrb[0].mxu0 }
  0xdd   :  { %v92_v7 = vadd.f32 %v85_v5, %v22_v4  ;;  %v144_v8 = vpop.f32.mrb[1].mxu0 }
  0xde   :  { %v88_v9 = vpop.f32.mrb[2].mxu0 }
  0xdf   :  { %95 = vst.msk [vmem:[#allocation2] sm:$0xff] %vm19_vm0, %v92_v7  ;;  %v93_v10 = vadd.f32 %v88_v9, %v23_v6  ;;  %v145_v11 = vpop.f32.mrb[3].mxu0 }
  0xe1   :  { %96 = vst.msk [vmem:[#allocation2 + $0x8] sm:$0xff] %vm19_vm0, %v93_v10 }
  0xe6   :  { %v100_v13 = vld [vmem:[#allocation2] sm:$0xff] }
  0xe7   :  { %v109_v14 = vadd.f32 %v130_v12, %v100_v13 }
  0xe8   :  { %v101_v15 = vld [vmem:[#allocation2 + $0x8] sm:$0xff] }
  0xe9   :  { %v133_v16 = vpack.c.bf16 %v109_v14, %v109_v14  ;;  %v110_v17 = vadd.f32 %v130_v12, %v101_v15 }
  0xeb   :  { %120 = vst.msk [vmem:[%s198_s3] sm:$0xf] %vm119_vm3, %v133_v16  ;;  %v134_v18 = vpack.c.bf16 %v110_v17, %v110_v17 }
  0xed   :  { %121 = vst.msk [vmem:[%s198_s3 + $0x4] sm:$0xf] %vm119_vm3, %v134_v18 }

// kernel: _lambda_.28
= control target key start
LH: loop header
LB: loop body
LE: loop exit
PB: predicated region body
PF: predicated region fallthrough
CT: control target
= control target key end

     0   :  { %vm31_vm0 = vcmask 261120   ;;  %v337_v0 = vmov 0.0   ;;  %vm338_vm1 = vmmov 0   ;;  %vm146_vm2 = vcmask 523264   ;;  %s430_s1 = inlined_call_operand.vmem [shape: bf16[32,64], index: 1, kind: input, shape index: {}]   ;;  %s431_s3 = inlined_call_operand.vmem [shape: bf16[64,32], index: 3, kind: input, shape index: {}]   ;;  %s432_s0 = inlined_call_operand.vmem [shape: bf16[16,32], index: 0, kind: input, shape index: {}]   ;;  %s433_s2 = inlined_call_operand.vmem [shape: f32[1,64], index: 2, kind: input, shape index: {}]   ;;  %s434_s4 = inlined_call_operand.vmem [shape: f32[1,32], index: 4, kind: input, shape index: {}]   ;;  %s435_s5 = inlined_call_operand.vmem [shape: f32[1,32], index: 5, kind: input, shape index: {}]   ;;  %s436_s6 = inlined_call_operand.vmem [shape: f32[1,32], index: 6, kind: input, shape index: {}]   ;;  %s437_s7 = inlined_call_operand.vmem [shape: bf16[16,32], index: 7, kind: output, shape index: {}]  }
   0x1   :  { %304 = vmatprep.subr.bf16.mxu0 %v337_v0  ;;  %v326_v1 = vld [vmem:[%s430_s1] sm:$0xff]   ;;  %308 = vmatprep.mubr.msk.bf16.mxu0 %vm338_vm1, %v337_v0  ;;  %32 = vst.msk [vmem:[#allocation2] sm:$0xff] %vm31_vm0, %v337_v0  ;;  %33 = vst.msk [vmem:[#allocation2 + $0x8] sm:$0xff] %vm31_vm0, %v337_v0  ;;  %v327_v2 = vld [vmem:[%s430_s1 + $0x8] sm:$0xff]   ;;  %vm268_vm3 = vcmask 257024  }
   0x2   :  { %312 = vmatprep.subr.bf16.mxu1 %v337_v0  ;;  %320 = vmatprep.mubr.msk.bf16.mxu1 %vm338_vm1, %v337_v0  ;;  %v329_v3 = vld [vmem:[%s431_s3] sm:$0xff]   ;;  %v330_v5 = vld [vmem:[%s431_s3 + $0x8] sm:$0xff]   ;;  %v331_v6 = vld [vmem:[%s431_s3 + $0x10] sm:$0xff]  }
   0x3   :  { %305 = vmatpush3.bf16.msra.mxu0 %v326_v1  ;;  %v328_v4 = vld [vmem:[%s432_s0] sm:$0xff]   ;;  %313 = vmatpush3.bf16.msra.mxu1 %v329_v3  ;;  %v332_v7 = vld [vmem:[%s431_s3 + $0x18] sm:$0xff]  }
   0x4   :  { %306 = vmatprep.subr.bf16.mxu0 %v337_v0  ;;  %314 = vmatprep.subr.bf16.mxu1 %v337_v0  ;;  %v275_v8 = vld [vmem:[%s433_s2] ss:$0 sm:$0xff] }
   0x5   :  { %v293_v26 = vld [vmem:[%s432_s0] sm:$0xff]  }
   0x6   :  { %v285_v27 = vld [vmem:[%s434_s4] ss:$0 sm:$0xff]  ;;  %v294_v28 = vunpack.c.l.bf16 %v293_v26  ;;  %v295_v31 = vunpack.c.h.bf16 %v293_v26 }
   0x7   :  { %307 = vmatpush3.bf16.msra.mxu0 %v327_v2  ;;  %315 = vmatpush3.bf16.msra.mxu1 %v330_v5  ;;  %v286_v55 = vld [vmem:[%s435_s5] ss:$0 sm:$0xff] }
   0x8   :  { %316 = vmatprep.subr.bf16.mxu1 %v337_v0  ;;  %v111_v18 = vld [vmem:[#allocation2] sm:$0xff]  ;;  %v112_v20 = vld [vmem:[#allocation2 + $0x8] sm:$0xff] }
   0x9   :  { %v287_v57 = vld [vmem:[%s436_s6] ss:$0 sm:$0xff] }
   0xa   :  { %309 = vmatmul.mubr.msk.bf16.vlgmr.msra.gmra.mrb[0].mxu0 %vm31_vm0, %v328_v4 }
   0xb   :  { %317 = vmatpush3.bf16.msra.mxu1 %v331_v6 }
   0xc   :  { %318 = vmatprep.subr.bf16.mxu1 %v337_v0 }
   0xf   :  { %319 = vmatpush3.bf16.msra.mxu1 %v332_v7 }
  0xdd   :  { %v102_v9 = vpop.f32.mrb[0].mxu0 }
  0xde   :  { %v103_v10 = vadd.f32 %v275_v8, %v102_v9  ;;  %v310_v11 = vpop.f32.mrb[1].mxu0 }
  0xdf   :  { %v105_v12 = vpop.f32.mrb[2].mxu0 }
  0xe0   :  { %v106_v13 = vadd.f32 %v275_v8, %v105_v12  ;;  %v311_v14 = vpop.f32.mrb[3].mxu0  ;;  %v109_v15 = vmax.f32 %v103_v10, 0.0 }
  0xe2   :  { %v110_v16 = vmax.f32 %v106_v13, 0.0 }
  0xe4   :  { %v113_v17 = vpack.c.bf16 %v110_v16, %v109_v15 }
  0xe6   :  { %321 = vmatmul.mubr.msk.bf16.vlgmr.msra.gmra.mrb[0].mxu1 %vm146_vm2, %v113_v17 }
 0x1b9   :  { %v184_v19 = vpop.f32.mrb[0].mxu1 }
 0x1ba   :  { %v191_v21 = vadd.f32 %v184_v19, %v111_v18  ;;  %v322_v22 = vpop.f32.mrb[1].mxu1 }
 0x1bb   :  { %v187_v23 = vpop.f32.mrb[2].mxu1 }
 0x1bc   :  { %193 = vst.msk [vmem:[#allocation2] sm:$0xff] %vm31_vm0, %v191_v21  ;;  %v192_v24 = vadd.f32 %v187_v23, %v112_v20  ;;  %v323_v25 = vpop.f32.mrb[3].mxu1 }
 0x1be   :  { %194 = vst.msk [vmem:[#allocation2 + $0x8] sm:$0xff] %vm31_vm0, %v192_v24 }
 0x1c3   :  { %v198_v29 = vld [vmem:[#allocation2] sm:$0xff] }
 0x1c4   :  { %v207_v30 = vadd.f32 %v285_v27, %v198_v29 }
 0x1c5   :  { %v199_v32 = vld [vmem:[#allocation2 + $0x8] sm:$0xff] }
 0x1c6   :  { %v213_v33 = vadd.f32 %v294_v28, %v207_v30  ;;  %v208_v34 = vadd.f32 %v285_v27, %v199_v32 }
 0x1c8   :  { %v215_v35 = vsel %vm31_vm0, %v213_v33, 0.0  ;;  %v214_v36 = vadd.f32 %v295_v31, %v208_v34 }
 0x1c9   :  { %216 = vadd.xlane.f32.xlu0 %v215_v35 }
 0x1ca   :  { %v218_v37 = vsel %vm31_vm0, %v214_v36, 0.0 }
 0x1cd   :  { %219 = vadd.xlane.f32.xlu0 %v218_v37 }
 0x256   :  { %v217_v38 = vpop.xlane.xlu0 %216 }
 0x257   :  { %v222_v39 = vmul.f32 0.03125, %v217_v38 }
 0x259   :  { %v224_v40 = vsub.f32 %v213_v33, %v222_v39 }
 0x25a   :  { %v220_v41 = vpop.xlane.xlu0 %219 }
 0x25b   :  { %v223_v42 = vmul.f32 0.03125, %v220_v41  ;;  %v226_v43 = vmul.f32 %v224_v40, %v224_v40 }
 0x25d   :  { %v225_v44 = vsub.f32 %v214_v36, %v223_v42  ;;  %v228_v45 = vsel %vm31_vm0, %v226_v43, 0.0 }
 0x25e   :  { %229 = vadd.xlane.f32.xlu1 %v228_v45 }
 0x25f   :  { %v227_v46 = vmul.f32 %v225_v44, %v225_v44 }
 0x261   :  { %v231_v47 = vsel %vm31_vm0, %v227_v46, 0.0 }
 0x262   :  { %232 = vadd.xlane.f32.xlu1 %v231_v47 }
 0x2eb   :  { %v230_v48 = vpop.xlane.xlu1 %229 }
 0x2ec   :  { %v234_v49 = vmul.f32 0.03125, %v230_v48 }
 0x2ee   :  { %v236_v50 = vadd.f32 1e-12, %v234_v49 }
 0x2ef   :  { %v233_v51 = vpop.xlane.xlu1 %232 }
 0x2f0   :  { %333 = vrsqrt.f32 %v236_v50  ;;  %v235_v52 = vmul.f32 0.03125, %v233_v51 }
 0x2f2   :  { %v237_v53 = vadd.f32 1e-12, %v235_v52 }
 0x2f4   :  { %335 = vrsqrt.f32 %v237_v53 }
 0x2fa   :  { %v334_v54 = vpop.eup %333 }
 0x2fb   :  { %v240_v56 = vmul.f32 %v334_v54, %v224_v40 }
 0x2fd   :  { %v249_v58 = vmul.f32 %v286_v55, %v240_v56 }
 0x2fe   :  { %v336_v59 = vpop.eup %335 }
 0x2ff   :  { %v258_v60 = vadd.f32 %v287_v57, %v249_v58  ;;  %v241_v61 = vmul.f32 %v336_v59, %v225_v44 }
 0x301   :  { %v290_v62 = vpack.c.bf16 %v258_v60, %v258_v60  ;;  %v250_v63 = vmul.f32 %v286_v55, %v241_v61 }
 0x303   :  { %269 = vst.msk [vmem:[%s437_s7] sm:$0xf] %vm268_vm3, %v290_v62  ;;  %v259_v0 = vadd.f32 %v287_v57, %v250_v63 }
 0x305   :  { %v291_v1 = vpack.c.bf16 %v259_v0, %v259_v0 }
 0x307   :  { %270 = vst.msk [vmem:[%s437_s7 + $0x4] sm:$0xf] %vm268_vm3, %v291_v1 }

// kernel: _lambda_.26
= control target key start
LH: loop header
LB: loop body
LE: loop exit
PB: predicated region body
PF: predicated region fallthrough
CT: control target
= control target key end

     0   :  { %s870_s9 = smov 0   ;;  %s976_s0 = inlined_call_operand.vmem [shape: bf16[2,8,96], index: 0, kind: input, shape index: {}]   ;;  %s977_s1 = inlined_call_operand.vmem [shape: bf16[2,8,8], index: 1, kind: input, shape index: {}]   ;;  %s978_s2 = inlined_call_operand.vmem [shape: bf16[2,8,32], index: 2, kind: output, shape index: {}]  }
   0x1 LB: > { %s714_s10 = sadd.s32 4294967295, %s842_s9   ;;  %p718_p0 = scmp.ge.s32.totalorder %s842_s9, 1  ;;  %s842_s9 = sphi %s870_s9, %s12_s9  }
   0x2   : > { %p120_p1 = scmp.lt.s32.totalorder %s842_s9, 3 }
   0x4   : > { %p121_p2 = pnand %p718_p0, %p120_p1 }
   0x5   : > { %p144_p3 = scmp.lt.s32.totalorder (!%p121_p2), %s714_s10, 1  ;;  %v844_v0 = vmov (!%p121_p2), 0.0   ;;  %vm845_vm0 = vmmov (!%p121_p2), 0   ;;  %s846_s15 = smov (!%p121_p2), 104   ;;  %vm182_vm1 = vcmask (!%p121_p2), 64512   ;;  %v850_v22 = vmov (!%p121_p2), 0  }
   0x6   : > { %124 = sbr.rel (%p121_p2) target bundleno = 1126 (0x466), region = 28  ;;  %752 = vmatprep.subr.bf16.mxu0 (!%p121_p2), %v844_v0  ;;  %758 = vmatprep.subr.bf16.mxu1 (!%p121_p2), %v844_v0  ;;  %s847_s16 = smov (!%p121_p2), 120   ;;  %vm441_vm4 = vcmask (!%p121_p2), 1043456   ;;  %vm642_vm5 = vcmask (!%p121_p2), 130048   ;;  %vm644_vm6 = vcmask (!%p121_p2), 195584   ;;  %vm647_vm7 = vcmask (!%p121_p2), 257024  }
   0x7   : > { %754 = vmatprep.mubr.msk.bf16.mxu0 (!%p121_p2), %vm845_vm0, %v844_v0  ;;  %760 = vmatprep.mubr.msk.bf16.mxu1 (!%p121_p2), %vm845_vm0, %v844_v0  ;;  %s848_s17 = smov (!%p121_p2), 112   ;;  %s849_s18 = smov (!%p121_p2), 96  }
   0x8   : > { %s851_s22 = smov (!%p121_p2), 64   ;;  %s852_s23 = smov (!%p121_p2), 8  }
   0x9   : > { %s853_s24 = smov (!%p121_p2), 16   ;;  %s854_s25 = smov (!%p121_p2), 24  }
   0xd   : > { %s982_s10 = smov (!%p144_p3, %s714_s10), 1 }
   0xe   : > { %s880_s11 = sshll.u32 %s982_s10, 2 }
   0xf   : > { %s147_s14 = scalar_lea.vmem %s976_s0, %s880_s11  ;;  %s151_s21 = scalar_lea.vmem %s977_s1, %s880_s11 }
  0x10   : > { %v160_v1 = vld [vmem:[%s147_s14] sm:$0xf]  ;;  %s155_s28 = scalar_lea.vmem %s978_s2, %s880_s11 }
  0x11   : > { %176 = vrot.lane.b32.xlu1 %v160_v1, %s846_s15  ;;  %172 = vrot.lane.b32.xlu0 %v160_v1, %s847_s16  ;;  %v890_v2 = vcombine.low %v160_v1, %v160_v1  ;;  %v161_v6 = vmul.bf16 1052065461, %v160_v1  ;;  %v162_v21 = vld [vmem:[%s151_s21] sm:$0xf] }
  0x12   : > { %vm163_vm2 = vcmp.gt.bf16.partialorder %v162_v21, 0 }
  0x13   : > { %v379_v23 = vsel %vm163_vm2, 65537, %v850_v22 }
  0x14   : > { %v380_v24 = vunpack.c.l.b16 %v379_v23 }
  0x15   : > { %174 = vrot.lane.b32.xlu0 %v160_v1, %s848_s17  ;;  %180 = vrot.lane.b32.xlu1 %v890_v2, %s849_s18 }
  0x16   : > { %vm926_vm3 = vcmp.ne.s32.totalorder %v380_v24, 0 }
  0x83   : > { %v177_v3 = vpop.permute.xlu1 %176  ;;  %v173_v4 = vpop.permute.xlu0 %172 }
  0x84   : > { %v893_v5 = vcombine.low %v173_v4, %v173_v4  ;;  %v899_v11 = vcombine.low %v177_v3, %v177_v3 }
  0x86   : > { %231 = vrot.lane.b32.xlu0 %v893_v5, %s849_s18 }
  0x87   : > { %v175_v7 = vpop.permute.xlu0 %174  ;;  %v181_v8 = vpop.permute.xlu1 %180 }
  0x88   : > { %v896_v9 = vcombine.low %v175_v7, %v175_v7  ;;  %v187_v10 = vsel %vm182_vm1, %v181_v8, 0 }
  0x89   : > { %753 = vmatpush3.bf16.xpose.msra.mxu0 %v187_v10 }
  0x8a   : > { %281 = vrot.lane.b32.xlu1 %v896_v9, %s849_s18  ;;  %165 = vrot.lane.b32.xlu0 %v161_v6, %s847_s16 }
  0x8b   : > { %764 = vmatprep.subr.bf16.mxu0 %v844_v0 }
  0x8e   : > { %331 = vrot.lane.b32.xlu1 %v899_v11, %s849_s18  ;;  %167 = vrot.lane.b32.xlu0 %v161_v6, %s848_s17 }
  0x90   : > { %755 = vmatmul.mubr.msk.bf16.vlgmr.msra.gmra.mrb[0].mxu0 %vm182_vm1, %v161_v6 }
  0x91   : > { %766 = vmatprep.mubr.msk.bf16.mxu0 %vm845_vm0, %v844_v0 }
  0x92   : > { %169 = vrot.lane.b32.xlu1 %v161_v6, %s846_s15 }
  0xf8   : > { %v232_v12 = vpop.permute.xlu0 %231 }
  0xf9   : > { %v237_v13 = vsel %vm182_vm1, %v232_v12, 0 }
  0xfa   : > { %759 = vmatpush3.bf16.xpose.msra.mxu1 %v237_v13 }
  0xfb   : > { %770 = vmatprep.subr.bf16.mxu1 %v844_v0 }
  0xfc   : > { %v282_v14 = vpop.permute.xlu1 %281  ;;  %v166_v15 = vpop.permute.xlu0 %165 }
  0xfd   : > { %v287_v16 = vsel %vm182_vm1, %v282_v14, 0 }
  0xfe   : > { %765 = vmatpush3.bf16.xpose.msra.mxu0 %v287_v16 }
  0xff   : > { %776 = vmatprep.subr.bf16.mxu0 %v844_v0 }
 0x100   : > { %v332_v17 = vpop.permute.xlu1 %331  ;;  %v168_v19 = vpop.permute.xlu0 %167 }
 0x101   : > { %v337_v18 = vsel %vm182_vm1, %v332_v17, 0  ;;  %761 = vmatmul.mubr.msk.bf16.vlgmr.msra.gmra.mrb[0].mxu1 %vm182_vm1, %v166_v15 }
 0x102   : > { %771 = vmatpush3.bf16.xpose.msra.mxu1 %v337_v18  ;;  %772 = vmatprep.mubr.msk.bf16.mxu1 %vm845_vm0, %v844_v0 }
 0x103   : > { %782 = vmatprep.subr.bf16.mxu1 %v844_v0 }
 0x104   : > { %v170_v20 = vpop.permute.xlu1 %169 }
 0x105   : > { %767 = vmatmul.mubr.msk.bf16.vlgmr.msra.gmra.mrb[4].mxu0 %vm182_vm1, %v168_v19 }
 0x106   : > { %778 = vmatprep.mubr.msk.bf16.mxu0 %vm845_vm0, %v844_v0 }
 0x109   : > { %773 = vmatmul.mubr.msk.bf16.vlgmr.msra.gmra.mrb[4].mxu1 %vm182_vm1, %v170_v20 }
 0x10a   : > { %784 = vmatprep.mubr.msk.bf16.mxu1 %vm845_vm0, %v844_v0 }
 0x163   : > { %v223_v26 = vpop.f32.mrb[0].mxu0 }
 0x164   : > { %v384_v27 = vsel %vm926_vm3, %v223_v26, -10000.0  ;;  %v756_v28 = vpop.f32.mrb[1].mxu0 }
 0x165   : > { %v388_v29 = vsel %vm182_vm1, %v384_v27, -inf  ;;  %v226_v30 = vpop.f32.mrb[2].mxu0 }
 0x166   : > { %389 = vmax.xlane.f32.xlu0 %v388_v29  ;;  %v757_v31 = vpop.f32.mrb[3].mxu0 }
 0x1d4   : > { %v273_v32 = vpop.f32.mrb[0].mxu1 }
 0x1d5   : > { %v385_v33 = vsel %vm926_vm3, %v273_v32, -10000.0  ;;  %v762_v34 = vpop.f32.mrb[1].mxu1 }
 0x1d6   : > { %v276_v35 = vpop.f32.mrb[2].mxu1  ;;  %v391_v36 = vsel %vm182_vm1, %v385_v33, -inf }
 0x1d7   : > { %392 = vmax.xlane.f32.xlu1 %v391_v36  ;;  %v763_v37 = vpop.f32.mrb[3].mxu1 }
 0x1d8   : > { %v323_v38 = vpop.f32.mrb[4].mxu0 }
 0x1d9   : > { %v386_v39 = vsel %vm926_vm3, %v323_v38, -10000.0  ;;  %v768_v40 = vpop.f32.mrb[5].mxu0 }
 0x1da   : > { %v326_v41 = vpop.f32.mrb[6].mxu0  ;;  %v394_v42 = vsel %vm182_vm1, %v386_v39, -inf }
 0x1db   : > { %395 = vmax.xlane.f32.xlu0 %v394_v42  ;;  %v769_v43 = vpop.f32.mrb[7].mxu0 }
 0x1dc   : > { %v373_v44 = vpop.f32.mrb[4].mxu1 }
 0x1dd   : > { %v387_v45 = vsel %vm926_vm3, %v373_v44, -10000.0  ;;  %v774_v46 = vpop.f32.mrb[5].mxu1 }
 0x1de   : > { %v376_v47 = vpop.f32.mrb[6].mxu1  ;;  %v397_v48 = vsel %vm182_vm1, %v387_v45, -inf }
 0x1df   : > { %v775_v49 = vpop.f32.mrb[7].mxu1  ;;  %398 = vmax.xlane.f32.xlu0 %v397_v48 }
 0x1e8   : > { %436 = vrot.lane.b32.xlu1 %v890_v2, %s851_s22 }
 0x1f3   : > { %v390_v50 = vpop.xlane.xlu0 %389 }
 0x1f4   : > { %v400_v51 = vsub.f32 %v384_v27, %v390_v50 }
 0x1f6   : > { %v404_v52 = vmul.f32 1.442695, %v400_v51 }
 0x1f8   : > { %820 = vpow2.f32 %v404_v52 }
 0x202   : > { %v821_v53 = vpop.eup %820 }
 0x203   : > { %v412_v54 = vsel %vm182_vm1, %v821_v53, 0.0 }
 0x20c   : > { %413 = vadd.xlane.f32.xlu1 %v412_v54 }
 0x264   : > { %v393_v55 = vpop.xlane.xlu1 %392 }
 0x265   : > { %v401_v56 = vsub.f32 %v385_v33, %v393_v55 }
 0x267   : > { %v406_v57 = vmul.f32 1.442695, %v401_v56 }
 0x268   : > { %v396_v58 = vpop.xlane.xlu0 %395  ;;  %v437_v59 = vpop.permute.xlu1 %436 }
 0x269   : > { %822 = vpow2.f32 %v406_v57  ;;  %v402_v60 = vsub.f32 %v386_v39, %v396_v58  ;;  %v443_v61 = vsel %vm441_vm4, %v437_v59, 0 }
 0x26a   : > { %777 = vmatpush3.bf16.msra.mxu0 %v443_v61 }
 0x26b   : > { %v408_v62 = vmul.f32 1.442695, %v402_v60  ;;  %788 = vmatprep.subr.bf16.mxu0 %v844_v0 }
 0x26c   : > { %v399_v63 = vpop.xlane.xlu0 %398 }
 0x26d   : > { %824 = vpow2.f32 %v408_v62  ;;  %v403_v1 = vsub.f32 %v387_v45, %v399_v63 }
 0x26f   : > { %v410_v2 = vmul.f32 1.442695, %v403_v1 }
 0x271   : > { %826 = vpow2.f32 %v410_v2 }
 0x273   : > { %v823_v3 = vpop.eup %822 }
 0x274   : > { %v415_v4 = vsel %vm182_vm1, %v823_v3, 0.0 }
 0x275   : > { %416 = vadd.xlane.f32.xlu0 %v415_v4 }
 0x277   : > { %v825_v6 = vpop.eup %824 }
 0x278   : > { %v418_v7 = vsel %vm182_vm1, %v825_v6, 0.0 }
 0x279   : > { %419 = vadd.xlane.f32.xlu1 %v418_v7 }
 0x27b   : > { %v827_v8 = vpop.eup %826 }
 0x27c   : > { %v421_v10 = vsel %vm182_vm1, %v827_v8, 0.0 }
 0x27d   : > { %422 = vadd.xlane.f32.xlu0 %v421_v10 }
 0x28a   : > { %533 = vrot.lane.b32.xlu1 %v896_v9, %s851_s22 }
 0x28e   : > { %581 = vrot.lane.b32.xlu1 %v899_v11, %s851_s22 }
 0x293   : > { %485 = vrot.lane.b32.xlu0 %v893_v5, %s851_s22 }
 0x299   : > { %v414_v12 = vpop.xlane.xlu1 %413 }
 0x29a   : > { %828 = vrcp.f32 %v414_v12 }
 0x2a4   : > { %v829_v13 = vpop.eup %828 }
 0x2a5   : > { %v428_v14 = vmul.f32 %v829_v13, %v821_v53 }
 0x2a7   : > { %v432_v15 = vpack.c.bf16 %v428_v14, %v428_v14 }
 0x2a9   : > { %779 = vmatmul.mubr.msk.bf16.vlgmr.msra.gmra.mrb[8].mxu0 %vm182_vm1, %v432_v15 }
 0x2aa   : > { %790 = vmatprep.mubr.msk.bf16.mxu0 %vm845_vm0, %v844_v0 }
 0x302   : > { %v417_v16 = vpop.xlane.xlu0 %416 }
 0x303   : > { %830 = vrcp.f32 %v417_v16 }
 0x306   : > { %v420_v17 = vpop.xlane.xlu1 %419 }
 0x307   : > { %832 = vrcp.f32 %v420_v17 }
 0x30a   : > { %v534_v9 = vpop.permute.xlu1 %533  ;;  %v423_v18 = vpop.xlane.xlu0 %422 }
 0x30b   : > { %v539_v11 = vsel %vm441_vm4, %v534_v9, 0  ;;  %834 = vrcp.f32 %v423_v18 }
 0x30c   : > { %789 = vmatpush3.bf16.msra.mxu0 %v539_v11 }
 0x30d   : > { %v831_v5 = vpop.eup %830 }
 0x30e   : > { %v429_v19 = vmul.f32 %v831_v5, %v823_v3  ;;  %v486_v20 = vpop.permute.xlu0 %485  ;;  %v582_v22 = vpop.permute.xlu1 %581 }
 0x30f   : > { %v491_v21 = vsel %vm441_vm4, %v486_v20, 0  ;;  %v587_v26 = vsel %vm441_vm4, %v582_v22, 0 }
 0x310   : > { %783 = vmatpush3.bf16.msra.mxu1 %v491_v21  ;;  %v433_v23 = vpack.c.bf16 %v429_v19, %v429_v19 }
 0x311   : > { %v833_v24 = vpop.eup %832  ;;  %794 = vmatprep.subr.bf16.mxu1 %v844_v0 }
 0x312   : > { %v430_v25 = vmul.f32 %v833_v24, %v825_v6 }
 0x313   : > { %785 = vmatmul.mubr.msk.bf16.vlgmr.msra.gmra.mrb[8].mxu1 %vm182_vm1, %v433_v23 }
 0x314   : > { %795 = vmatpush3.bf16.msra.mxu1 %v587_v26  ;;  %v434_v27 = vpack.c.bf16 %v430_v25, %v430_v25  ;;  %796 = vmatprep.mubr.msk.bf16.mxu1 %vm845_vm0, %v844_v0 }
 0x315   : > { %v835_v28 = vpop.eup %834 }
 0x316   : > { %v431_v29 = vmul.f32 %v835_v28, %v827_v8  ;;  %791 = vmatmul.mubr.msk.bf16.vlgmr.msra.gmra.mrb[12].mxu0 %vm182_vm1, %v434_v27 }
 0x318   : > { %v435_v30 = vpack.c.bf16 %v431_v29, %v431_v29 }
 0x31b   : > { %797 = vmatmul.mubr.msk.bf16.vlgmr.msra.gmra.mrb[12].mxu1 %vm182_vm1, %v435_v30 }
 0x37c   : > { %v479_v31 = vpop.f32.mrb[8].mxu0 }
 0x37d   : > { %v780_v32 = vpop.f32.mrb[9].mxu0 }
 0x37e   : > { %v482_v33 = vpop.f32.mrb[10].mxu0 }
 0x37f   : > { %v781_v34 = vpop.f32.mrb[11].mxu0 }
 0x3e6   : > { %v527_v35 = vpop.f32.mrb[8].mxu1 }
 0x3e7   : > { %630 = vrot.lane.b32.xlu0 %v527_v35, %s852_s23  ;;  %v786_v36 = vpop.f32.mrb[9].mxu1 }
 0x3e8   : > { %v530_v37 = vpop.f32.mrb[10].mxu1 }
 0x3e9   : > { %v787_v38 = vpop.f32.mrb[11].mxu1  ;;  %v575_v39 = vpop.f32.mrb[12].mxu0 }
 0x3ea   : > { %634 = vrot.lane.b32.xlu1 %v575_v39, %s853_s24  ;;  %v792_v0 = vpop.f32.mrb[13].mxu0 }
 0x3eb   : > { %v578_v40 = vpop.f32.mrb[14].mxu0 }
 0x3ec   : > { %v793_v41 = vpop.f32.mrb[15].mxu0 }
 0x3ee   : > { %v623_v42 = vpop.f32.mrb[12].mxu1 }
 0x3ef   : > { %638 = vrot.lane.b32.xlu0 %v623_v42, %s854_s25  ;;  %v798_v43 = vpop.f32.mrb[13].mxu1 }
 0x3f0   : > { %v626_v44 = vpop.f32.mrb[14].mxu1 }
 0x3f1   : > { %v799_v45 = vpop.f32.mrb[15].mxu1 }
 0x459   : > { %v631_v46 = vpop.permute.xlu0 %630 }
 0x45a   : > { %v641_v48 = vsel %vm182_vm1, %v479_v31, %v631_v46 }
 0x45c   : > { %v635_v47 = vpop.permute.xlu1 %634 }
 0x45d   : > { %v643_v49 = vsel %vm642_vm5, %v641_v48, %v635_v47 }
 0x461   : > { %v639_v50 = vpop.permute.xlu0 %638 }
 0x462   : > { %v645_v51 = vsel %vm644_vm6, %v643_v49, %v639_v50 }
 0x463   : > { %v646_v52 = vpack.c.bf16 %v645_v51, %v645_v51 }
 0x465   : > { %648 = vst.msk [vmem:[%s155_s28] sm:$0xf] %vm647_vm7, %v646_v52 }
 0x466 PF: > { %s12_s9 = sadd.s32 1, %s842_s9  }
 0x467   : > { %p9_p4 = scmp.ge.s32.totalorder %s12_s9, 4  }
 0x469   :  { %11 = sbr.rel (!%p9_p4) target bundleno = 1 (0x1), region = 61 }

// kernel: _lambda_.37
= control target key start
LH: loop header
LB: loop body
LE: loop exit
PB: predicated region body
PF: predicated region fallthrough
CT: control target
= control target key end

     0   :  { %vm19_vm0 = vcmask 523264   ;;  %v151_v0 = vmov 0.0   ;;  %vm152_vm1 = vmmov 0   ;;  %vm47_vm2 = vcmask 261120   ;;  %s195_s1 = inlined_call_operand.vmem [shape: bf16[32,64], index: 1, kind: input, shape index: {}]   ;;  %s196_s0 = inlined_call_operand.vmem [shape: bf16[16,32], index: 0, kind: input, shape index: {}]   ;;  %s197_s2 = inlined_call_operand.vmem [shape: f32[1,64], index: 2, kind: input, shape index: {}]   ;;  %s198_s3 = inlined_call_operand.vmem [shape: bf16[16,64], index: 3, kind: output, shape index: {}]  }
   0x1   :  { %138 = vmatprep.subr.bf16.mxu0 %v151_v0  ;;  %v148_v1 = vld [vmem:[%s195_s1] sm:$0xff]   ;;  %142 = vmatprep.mubr.msk.bf16.mxu0 %vm152_vm1, %v151_v0  ;;  %20 = vst.msk [vmem:[#allocation2] sm:$0xff] %vm19_vm0, %v151_v0  ;;  %21 = vst.msk [vmem:[#allocation2 + $0x8] sm:$0xff] %vm19_vm0, %v151_v0  ;;  %v149_v2 = vld [vmem:[%s195_s1 + $0x8] sm:$0xff]   ;;  %vm119_vm3 = vcmask 519168  }
   0x2   :  { %139 = vmatpush3.bf16.msra.mxu0 %v148_v1  ;;  %v150_v3 = vld [vmem:[%s196_s0] sm:$0xff]  }
   0x3   :  { %140 = vmatprep.subr.bf16.mxu0 %v151_v0  ;;  %v130_v12 = vld [vmem:[%s197_s2] ss:$0 sm:$0xff] }
   0x6   :  { %141 = vmatpush3.bf16.msra.mxu0 %v149_v2 }
   0x8   :  { %v22_v4 = vld [vmem:[#allocation2] sm:$0xff]  ;;  %v23_v6 = vld [vmem:[#allocation2 + $0x8] sm:$0xff] }
   0x9   :  { %143 = vmatmul.mubr.msk.bf16.vlgmr.msra.gmra.mrb[0].mxu0 %vm47_vm2, %v150_v3 }
  0xdc   :  { %v85_v5 = vpop.f32.mrb[0].mxu0 }
  0xdd   :  { %v92_v7 = vadd.f32 %v85_v5, %v22_v4  ;;  %v144_v8 = vpop.f32.mrb[1].mxu0 }
  0xde   :  { %v88_v9 = vpop.f32.mrb[2].mxu0 }
  0xdf   :  { %95 = vst.msk [vmem:[#allocation2] sm:$0xff] %vm19_vm0, %v92_v7  ;;  %v93_v10 = vadd.f32 %v88_v9, %v23_v6  ;;  %v145_v11 = vpop.f32.mrb[3].mxu0 }
  0xe1   :  { %96 = vst.msk [vmem:[#allocation2 + $0x8] sm:$0xff] %vm19_vm0, %v93_v10 }
  0xe6   :  { %v100_v13 = vld [vmem:[#allocation2] sm:$0xff] }
  0xe7   :  { %v109_v14 = vadd.f32 %v130_v12, %v100_v13 }
  0xe8   :  { %v101_v15 = vld [vmem:[#allocation2 + $0x8] sm:$0xff] }
  0xe9   :  { %v133_v16 = vpack.c.bf16 %v109_v14, %v109_v14  ;;  %v110_v17 = vadd.f32 %v130_v12, %v101_v15 }
  0xeb   :  { %120 = vst.msk [vmem:[%s198_s3] sm:$0xf] %vm119_vm3, %v133_v16  ;;  %v134_v18 = vpack.c.bf16 %v110_v17, %v110_v17 }
  0xed   :  { %121 = vst.msk [vmem:[%s198_s3 + $0x4] sm:$0xf] %vm119_vm3, %v134_v18 }

// kernel: _lambda_.36
= control target key start
LH: loop header
LB: loop body
LE: loop exit
PB: predicated region body
PF: predicated region fallthrough
CT: control target
= control target key end

     0   :  { %vm19_vm0 = vcmask 261120   ;;  %v150_v0 = vmov 0.0   ;;  %vm151_vm1 = vmmov 0   ;;  %vm118_vm2 = vcmask 257024   ;;  %s195_s1 = inlined_call_operand.vmem [shape: bf16[32,32], index: 1, kind: input, shape index: {}]   ;;  %s196_s0 = inlined_call_operand.vmem [shape: bf16[16,32], index: 0, kind: input, shape index: {}]   ;;  %s197_s2 = inlined_call_operand.vmem [shape: f32[1,32], index: 2, kind: input, shape index: {}]   ;;  %s198_s3 = inlined_call_operand.vmem [shape: bf16[16,32], index: 3, kind: output, shape index: {}]  }
   0x1   :  { %137 = vmatprep.subr.bf16.mxu0 %v150_v0  ;;  %v147_v1 = vld [vmem:[%s195_s1] sm:$0xff]   ;;  %141 = vmatprep.mubr.msk.bf16.mxu0 %vm151_vm1, %v150_v0  ;;  %20 = vst.msk [vmem:[#allocation2] sm:$0xff] %vm19_vm0, %v150_v0  ;;  %21 = vst.msk [vmem:[#allocation2 + $0x8] sm:$0xff] %vm19_vm0, %v150_v0  ;;  %v148_v2 = vld [vmem:[%s195_s1 + $0x8] sm:$0xff]  }
   0x2   :  { %138 = vmatpush3.bf16.msra.mxu0 %v147_v1  ;;  %v149_v3 = vld [vmem:[%s196_s0] sm:$0xff]  }
   0x3   :  { %139 = vmatprep.subr.bf16.mxu0 %v150_v0  ;;  %v129_v12 = vld [vmem:[%s197_s2] ss:$0 sm:$0xff] }
   0x6   :  { %140 = vmatpush3.bf16.msra.mxu0 %v148_v2 }
   0x8   :  { %v22_v4 = vld [vmem:[#allocation2] sm:$0xff]  ;;  %v23_v6 = vld [vmem:[#allocation2 + $0x8] sm:$0xff] }
   0x9   :  { %142 = vmatmul.mubr.msk.bf16.vlgmr.msra.gmra.mrb[0].mxu0 %vm19_vm0, %v149_v3 }
  0xdc   :  { %v85_v5 = vpop.f32.mrb[0].mxu0 }
  0xdd   :  { %v92_v7 = vadd.f32 %v85_v5, %v22_v4  ;;  %v143_v8 = vpop.f32.mrb[1].mxu0 }
  0xde   :  { %v88_v9 = vpop.f32.mrb[2].mxu0 }
  0xdf   :  { %94 = vst.msk [vmem:[#allocation2] sm:$0xff] %vm19_vm0, %v92_v7  ;;  %v93_v10 = vadd.f32 %v88_v9, %v23_v6  ;;  %v144_v11 = vpop.f32.mrb[3].mxu0 }
  0xe1   :  { %95 = vst.msk [vmem:[#allocation2 + $0x8] sm:$0xff] %vm19_vm0, %v93_v10 }
  0xe6   :  { %v99_v13 = vld [vmem:[#allocation2] sm:$0xff] }
  0xe7   :  { %v108_v14 = vadd.f32 %v129_v12, %v99_v13 }
  0xe8   :  { %v100_v15 = vld [vmem:[#allocation2 + $0x8] sm:$0xff] }
  0xe9   :  { %v132_v16 = vpack.c.bf16 %v108_v14, %v108_v14  ;;  %v109_v17 = vadd.f32 %v129_v12, %v100_v15 }
  0xeb   :  { %119 = vst.msk [vmem:[%s198_s3] sm:$0xf] %vm118_vm2, %v132_v16  ;;  %v133_v18 = vpack.c.bf16 %v109_v17, %v109_v17 }
  0xed   :  { %120 = vst.msk [vmem:[%s198_s3 + $0x4] sm:$0xf] %vm118_vm2, %v133_v18 }

// kernel: _lambda_.38
= control target key start
LH: loop header
LB: loop body
LE: loop exit
PB: predicated region body
PF: predicated region fallthrough
CT: control target
= control target key end

     0   :  { %s923_s12 = smov 0   ;;  %s1040_s0 = inlined_call_operand.vmem [shape: bf16[2,8,32], index: 0, kind: input, shape index: {}]   ;;  %s1041_s1 = inlined_call_operand.vmem [shape: bf16[2,8,64], index: 1, kind: input, shape index: {}]   ;;  %s1042_s2 = inlined_call_operand.vmem [shape: bf16[2,8,8], index: 2, kind: input, shape index: {}]   ;;  %s1043_s3 = inlined_call_operand.vmem [shape: bf16[2,8,32], index: 3, kind: output, shape index: {}]  }
   0x1 LB: > { %s763_s13 = sadd.s32 4294967295, %s891_s12   ;;  %p767_p0 = scmp.ge.s32.totalorder %s891_s12, 1  ;;  %s891_s12 = sphi %s923_s12, %s13_s12  }
   0x2   : > { %p154_p1 = scmp.lt.s32.totalorder %s891_s12, 3 }
   0x4   : > { %p155_p2 = pnand %p767_p0, %p154_p1 }
   0x5   : > { %p184_p3 = scmp.lt.s32.totalorder (!%p155_p2), %s763_s13, 1  ;;  %v893_v0 = vmov (!%p155_p2), 0.0   ;;  %vm894_vm0 = vmmov (!%p155_p2), 0   ;;  %vm223_vm1 = vcmask (!%p155_p2), 64512   ;;  %s895_s21 = smov (!%p155_p2), 120   ;;  %v898_v15 = vmov (!%p155_p2), 0  }
   0x6   : > { %158 = sbr.rel (%p155_p2) target bundleno = 1009 (0x3f1), region = 32  ;;  %802 = vmatprep.subr.bf16.mxu0 (!%p155_p2), %v893_v0  ;;  %804 = vmatprep.mubr.msk.bf16.mxu0 (!%p155_p2), %vm894_vm0, %v893_v0  ;;  %s896_s22 = smov (!%p155_p2), 112   ;;  %vm472_vm4 = vcmask (!%p155_p2), 1043456   ;;  %vm679_vm5 = vcmask (!%p155_p2), 130048   ;;  %vm681_vm6 = vcmask (!%p155_p2), 195584   ;;  %vm684_vm7 = vcmask (!%p155_p2), 257024  }
   0x7   : > { %808 = vmatprep.subr.bf16.mxu1 (!%p155_p2), %v893_v0  ;;  %810 = vmatprep.mubr.msk.bf16.mxu1 (!%p155_p2), %vm894_vm0, %v893_v0  ;;  %s897_s23 = smov (!%p155_p2), 104   ;;  %s899_s27 = smov (!%p155_p2), 96  }
   0x8   : > { %s900_s28 = smov (!%p155_p2), 8   ;;  %s901_s29 = smov (!%p155_p2), 16  }
   0x9   : > { %s902_s30 = smov (!%p155_p2), 24  }
   0xd   : > { %s1047_s13 = smov (!%p184_p3, %s763_s13), 1 }
   0xe   : > { %s937_s14 = sshll.u32 %s1047_s13, 2 }
   0xf   : > { %s191_s17 = scalar_lea.vmem %s1041_s1, %s937_s14  ;;  %s187_s20 = scalar_lea.vmem %s1040_s0, %s937_s14 }
  0x10   : > { %v947_v1 = vld [vmem:[%s191_s17] sm:$0xf]  ;;  %s195_s26 = scalar_lea.vmem %s1042_s2, %s937_s14  ;;  %s199_s6 = scalar_lea.vmem %s1043_s3, %s937_s14 }
  0x11   : > { %v204_v2 = vld [vmem:[%s187_s20] sm:$0xf]  ;;  %217 = vrot.lane.b32.xlu0 %v947_v1, %s895_s21  ;;  %v228_v3 = vsel %vm223_vm1, %v947_v1, 0  ;;  %v776_v43 = vcombine.low %v947_v1, %v947_v1 }
  0x12   : > { %v205_v4 = vmul.bf16 1052065461, %v204_v2  ;;  %803 = vmatpush3.bf16.xpose.msra.mxu0 %v228_v3  ;;  %v207_v14 = vld [vmem:[%s195_s26] sm:$0xf] }
  0x13   : > { %814 = vmatprep.subr.bf16.mxu0 %v893_v0  ;;  %vm208_vm2 = vcmp.gt.bf16.partialorder %v207_v14, 0 }
  0x14   : > { %210 = vrot.lane.b32.xlu1 %v205_v4, %s895_s21  ;;  %v408_v16 = vsel %vm208_vm2, 65537, %v898_v15 }
  0x15   : > { %219 = vrot.lane.b32.xlu0 %v947_v1, %s896_s22  ;;  %v409_v17 = vunpack.c.l.b16 %v408_v16 }
  0x17   : > { %vm986_vm3 = vcmp.ne.s32.totalorder %v409_v17, 0 }
  0x18   : > { %221 = vrot.lane.b32.xlu1 %v947_v1, %s897_s23 }
  0x19   : > { %805 = vmatmul.mubr.msk.bf16.vlgmr.msra.gmra.mrb[0].mxu0 %vm223_vm1, %v205_v4  ;;  %212 = vrot.lane.b32.xlu0 %v205_v4, %s896_s22 }
  0x1a   : > { %816 = vmatprep.mubr.msk.bf16.mxu0 %vm894_vm0, %v893_v0 }
  0x1c   : > { %214 = vrot.lane.b32.xlu1 %v205_v4, %s897_s23 }
  0x83   : > { %v958_v5 = vpop.permute.xlu0 %217 }
  0x84   : > { %v274_v6 = vsel %vm223_vm1, %v958_v5, 0 }
  0x85   : > { %809 = vmatpush3.bf16.xpose.msra.mxu1 %v274_v6  ;;  %v778_v6 = vcombine.low %v958_v5, %v958_v5 }
  0x86   : > { %v211_v7 = vpop.permute.xlu1 %210  ;;  %820 = vmatprep.subr.bf16.mxu1 %v893_v0 }
  0x87   : > { %v963_v8 = vpop.permute.xlu0 %219 }
  0x88   : > { %v320_v9 = vsel %vm223_vm1, %v963_v8, 0  ;;  %v780_v3 = vcombine.low %v963_v8, %v963_v8 }
  0x89   : > { %815 = vmatpush3.bf16.xpose.msra.mxu0 %v320_v9 }
  0x8a   : > { %v967_v10 = vpop.permute.xlu1 %221  ;;  %826 = vmatprep.subr.bf16.mxu0 %v893_v0 }
  0x8b   : > { %v366_v11 = vsel %vm223_vm1, %v967_v10, 0  ;;  %v213_v12 = vpop.permute.xlu0 %212  ;;  %v782_v4 = vcombine.low %v967_v10, %v967_v10 }
  0x8c   : > { %811 = vmatmul.mubr.msk.bf16.vlgmr.msra.gmra.mrb[0].mxu1 %vm223_vm1, %v211_v7 }
  0x8d   : > { %821 = vmatpush3.bf16.xpose.msra.mxu1 %v366_v11  ;;  %822 = vmatprep.mubr.msk.bf16.mxu1 %vm894_vm0, %v893_v0 }
  0x8e   : > { %832 = vmatprep.subr.bf16.mxu1 %v893_v0  ;;  %v215_v13 = vpop.permute.xlu1 %214 }
  0x90   : > { %817 = vmatmul.mubr.msk.bf16.vlgmr.msra.gmra.mrb[4].mxu0 %vm223_vm1, %v213_v12 }
  0x91   : > { %828 = vmatprep.mubr.msk.bf16.mxu0 %vm894_vm0, %v893_v0 }
  0x94   : > { %823 = vmatmul.mubr.msk.bf16.vlgmr.msra.gmra.mrb[4].mxu1 %vm223_vm1, %v215_v13 }
  0x95   : > { %834 = vmatprep.mubr.msk.bf16.mxu1 %vm894_vm0, %v893_v0 }
  0xec   : > { %v264_v19 = vpop.f32.mrb[0].mxu0 }
  0xed   : > { %v413_v20 = vsel %vm986_vm3, %v264_v19, -10000.0  ;;  %v806_v21 = vpop.f32.mrb[1].mxu0 }
  0xee   : > { %v417_v22 = vsel %vm223_vm1, %v413_v20, -inf  ;;  %v267_v23 = vpop.f32.mrb[2].mxu0 }
  0xef   : > { %418 = vmax.xlane.f32.xlu0 %v417_v22  ;;  %v807_v24 = vpop.f32.mrb[3].mxu0 }
 0x15f   : > { %v310_v25 = vpop.f32.mrb[0].mxu1 }
 0x160   : > { %v414_v26 = vsel %vm986_vm3, %v310_v25, -10000.0  ;;  %v812_v27 = vpop.f32.mrb[1].mxu1 }
 0x161   : > { %v313_v28 = vpop.f32.mrb[2].mxu1  ;;  %v420_v29 = vsel %vm223_vm1, %v414_v26, -inf }
 0x162   : > { %421 = vmax.xlane.f32.xlu1 %v420_v29  ;;  %v813_v30 = vpop.f32.mrb[3].mxu1 }
 0x163   : > { %v356_v31 = vpop.f32.mrb[4].mxu0 }
 0x164   : > { %v415_v32 = vsel %vm986_vm3, %v356_v31, -10000.0  ;;  %v818_v33 = vpop.f32.mrb[5].mxu0 }
 0x165   : > { %v359_v34 = vpop.f32.mrb[6].mxu0  ;;  %v423_v35 = vsel %vm223_vm1, %v415_v32, -inf }
 0x166   : > { %424 = vmax.xlane.f32.xlu0 %v423_v35  ;;  %v819_v36 = vpop.f32.mrb[7].mxu0 }
 0x167   : > { %v402_v37 = vpop.f32.mrb[4].mxu1 }
 0x168   : > { %v416_v38 = vsel %vm986_vm3, %v402_v37, -10000.0  ;;  %v824_v39 = vpop.f32.mrb[5].mxu1 }
 0x169   : > { %v405_v40 = vpop.f32.mrb[6].mxu1  ;;  %v426_v41 = vsel %vm223_vm1, %v416_v38, -inf }
 0x16a   : > { %v825_v42 = vpop.f32.mrb[7].mxu1  ;;  %427 = vmax.xlane.f32.xlu0 %v426_v41 }
 0x173   : > { %467 = vrot.lane.b32.xlu1 %v776_v43, %s899_s27 }
 0x17c   : > { %v419_v44 = vpop.xlane.xlu0 %418 }
 0x17d   : > { %v429_v45 = vsub.f32 %v413_v20, %v419_v44 }
 0x17f   : > { %v433_v46 = vmul.f32 1.442695, %v429_v45 }
 0x181   : > { %869 = vpow2.f32 %v433_v46 }
 0x18b   : > { %v870_v47 = vpop.eup %869 }
 0x18c   : > { %v441_v48 = vsel %vm223_vm1, %v870_v47, 0.0 }
 0x197   : > { %442 = vadd.xlane.f32.xlu1 %v441_v48 }
 0x1ef   : > { %v422_v49 = vpop.xlane.xlu1 %421 }
 0x1f0   : > { %v430_v50 = vsub.f32 %v414_v26, %v422_v49 }
 0x1f2   : > { %v435_v51 = vmul.f32 1.442695, %v430_v50 }
 0x1f3   : > { %v425_v52 = vpop.xlane.xlu0 %424  ;;  %v468_v53 = vpop.permute.xlu1 %467 }
 0x1f4   : > { %871 = vpow2.f32 %v435_v51  ;;  %v431_v54 = vsub.f32 %v415_v32, %v425_v52  ;;  %v474_v55 = vsel %vm472_vm4, %v468_v53, 0 }
 0x1f5   : > { %827 = vmatpush3.bf16.msra.mxu0 %v474_v55 }
 0x1f6   : > { %v437_v56 = vmul.f32 1.442695, %v431_v54  ;;  %838 = vmatprep.subr.bf16.mxu0 %v893_v0 }
 0x1f7   : > { %v428_v57 = vpop.xlane.xlu0 %427 }
 0x1f8   : > { %873 = vpow2.f32 %v437_v56  ;;  %v432_v58 = vsub.f32 %v416_v38, %v428_v57 }
 0x1fa   : > { %v439_v59 = vmul.f32 1.442695, %v432_v58 }
 0x1fc   : > { %875 = vpow2.f32 %v439_v59 }
 0x1fe   : > { %v872_v60 = vpop.eup %871 }
 0x1ff   : > { %v444_v61 = vsel %vm223_vm1, %v872_v60, 0.0 }
 0x200   : > { %445 = vadd.xlane.f32.xlu0 %v444_v61 }
 0x202   : > { %v874_v62 = vpop.eup %873 }
 0x203   : > { %v447_v63 = vsel %vm223_vm1, %v874_v62, 0.0 }
 0x204   : > { %448 = vadd.xlane.f32.xlu1 %v447_v63 }
 0x206   : > { %v876_v1 = vpop.eup %875 }
 0x207   : > { %v450_v2 = vsel %vm223_vm1, %v876_v1, 0.0 }
 0x208   : > { %451 = vadd.xlane.f32.xlu0 %v450_v2 }
 0x215   : > { %568 = vrot.lane.b32.xlu1 %v780_v3, %s899_s27 }
 0x219   : > { %618 = vrot.lane.b32.xlu1 %v782_v4, %s899_s27 }
 0x21e   : > { %518 = vrot.lane.b32.xlu0 %v778_v6, %s899_s27 }
 0x224   : > { %v443_v7 = vpop.xlane.xlu1 %442 }
 0x225   : > { %877 = vrcp.f32 %v443_v7 }
 0x22f   : > { %v878_v9 = vpop.eup %877 }
 0x230   : > { %v457_v11 = vmul.f32 %v878_v9, %v870_v47 }
 0x232   : > { %v461_v12 = vpack.c.bf16 %v457_v11, %v457_v11 }
 0x234   : > { %829 = vmatmul.mubr.msk.bf16.vlgmr.msra.gmra.mrb[8].mxu0 %vm223_vm1, %v461_v12 }
 0x235   : > { %840 = vmatprep.mubr.msk.bf16.mxu0 %vm894_vm0, %v893_v0 }
 0x28d   : > { %v446_v8 = vpop.xlane.xlu0 %445 }
 0x28e   : > { %879 = vrcp.f32 %v446_v8 }
 0x291   : > { %v449_v10 = vpop.xlane.xlu1 %448 }
 0x292   : > { %881 = vrcp.f32 %v449_v10 }
 0x295   : > { %v569_v13 = vpop.permute.xlu1 %568  ;;  %v452_v14 = vpop.xlane.xlu0 %451 }
 0x296   : > { %v574_v5 = vsel %vm472_vm4, %v569_v13, 0  ;;  %883 = vrcp.f32 %v452_v14 }
 0x297   : > { %839 = vmatpush3.bf16.msra.mxu0 %v574_v5 }
 0x298   : > { %v880_v15 = vpop.eup %879 }
 0x299   : > { %v458_v16 = vmul.f32 %v880_v15, %v872_v60  ;;  %v519_v17 = vpop.permute.xlu0 %518  ;;  %v619_v19 = vpop.permute.xlu1 %618 }
 0x29a   : > { %v524_v18 = vsel %vm472_vm4, %v519_v17, 0  ;;  %v624_v23 = vsel %vm472_vm4, %v619_v19, 0 }
 0x29b   : > { %833 = vmatpush3.bf16.msra.mxu1 %v524_v18  ;;  %v462_v20 = vpack.c.bf16 %v458_v16, %v458_v16 }
 0x29c   : > { %v882_v21 = vpop.eup %881  ;;  %844 = vmatprep.subr.bf16.mxu1 %v893_v0 }
 0x29d   : > { %v459_v22 = vmul.f32 %v882_v21, %v874_v62 }
 0x29e   : > { %835 = vmatmul.mubr.msk.bf16.vlgmr.msra.gmra.mrb[8].mxu1 %vm223_vm1, %v462_v20 }
 0x29f   : > { %845 = vmatpush3.bf16.msra.mxu1 %v624_v23  ;;  %v463_v24 = vpack.c.bf16 %v459_v22, %v459_v22  ;;  %846 = vmatprep.mubr.msk.bf16.mxu1 %vm894_vm0, %v893_v0 }
 0x2a0   : > { %v884_v25 = vpop.eup %883 }
 0x2a1   : > { %v460_v26 = vmul.f32 %v884_v25, %v876_v1  ;;  %841 = vmatmul.mubr.msk.bf16.vlgmr.msra.gmra.mrb[12].mxu0 %vm223_vm1, %v463_v24 }
 0x2a3   : > { %v464_v27 = vpack.c.bf16 %v460_v26, %v460_v26 }
 0x2a6   : > { %847 = vmatmul.mubr.msk.bf16.vlgmr.msra.gmra.mrb[12].mxu1 %vm223_vm1, %v464_v27 }
 0x307   : > { %v510_v28 = vpop.f32.mrb[8].mxu0 }
 0x308   : > { %v830_v29 = vpop.f32.mrb[9].mxu0 }
 0x309   : > { %v513_v30 = vpop.f32.mrb[10].mxu0 }
 0x30a   : > { %v831_v31 = vpop.f32.mrb[11].mxu0 }
 0x371   : > { %v560_v32 = vpop.f32.mrb[8].mxu1 }
 0x372   : > { %667 = vrot.lane.b32.xlu0 %v560_v32, %s900_s28  ;;  %v836_v33 = vpop.f32.mrb[9].mxu1 }
 0x373   : > { %v563_v34 = vpop.f32.mrb[10].mxu1 }
 0x374   : > { %v837_v35 = vpop.f32.mrb[11].mxu1  ;;  %v610_v36 = vpop.f32.mrb[12].mxu0 }
 0x375   : > { %671 = vrot.lane.b32.xlu1 %v610_v36, %s901_s29  ;;  %v842_v0 = vpop.f32.mrb[13].mxu0 }
 0x376   : > { %v613_v37 = vpop.f32.mrb[14].mxu0 }
 0x377   : > { %v843_v38 = vpop.f32.mrb[15].mxu0 }
 0x379   : > { %v660_v39 = vpop.f32.mrb[12].mxu1 }
 0x37a   : > { %675 = vrot.lane.b32.xlu0 %v660_v39, %s902_s30  ;;  %v848_v40 = vpop.f32.mrb[13].mxu1 }
 0x37b   : > { %v663_v41 = vpop.f32.mrb[14].mxu1 }
 0x37c   : > { %v849_v42 = vpop.f32.mrb[15].mxu1 }
 0x3e4   : > { %v668_v43 = vpop.permute.xlu0 %667 }
 0x3e5   : > { %v678_v45 = vsel %vm223_vm1, %v510_v28, %v668_v43 }
 0x3e7   : > { %v672_v44 = vpop.permute.xlu1 %671 }
 0x3e8   : > { %v680_v46 = vsel %vm679_vm5, %v678_v45, %v672_v44 }
 0x3ec   : > { %v676_v47 = vpop.permute.xlu0 %675 }
 0x3ed   : > { %v682_v48 = vsel %vm681_vm6, %v680_v46, %v676_v47 }
 0x3ee   : > { %v683_v49 = vpack.c.bf16 %v682_v48, %v682_v48 }
 0x3f0   : > { %685 = vst.msk [vmem:[%s199_s6] sm:$0xf] %vm684_vm7, %v683_v49 }
 0x3f1 PF: > { %s13_s12 = sadd.s32 1, %s891_s12  }
 0x3f2   : > { %p10_p4 = scmp.ge.s32.totalorder %s13_s12, 4  }
 0x3f4   :  { %12 = sbr.rel (!%p10_p4) target bundleno = 1 (0x1), region = 68 }

// kernel: _lambda_.49
= control target key start
LH: loop header
LB: loop body
LE: loop exit
PB: predicated region body
PF: predicated region fallthrough
CT: control target
= control target key end

     0   :  { %v178_v1 = vmov 0.0   ;;  %vm179_vm0 = vmmov 0   ;;  %vm20_vm1 = vcmask 162816   ;;  %s233_s0 = inlined_call_operand.vmem [shape: bf16[16,32], index: 0, kind: input, shape index: {}]   ;;  %s234_s1 = inlined_call_operand.vmem [shape: bf16[32,20], index: 1, kind: input, shape index: {}]   ;;  %s235_s2 = inlined_call_operand.vmem [shape: f32[1,20], index: 2, kind: input, shape index: {}]   ;;  %s236_s3 = inlined_call_operand.hbm [shape: f32[16,20], index: 3, kind: output, shape index: {}]  }
   0x1   :  { %v151_v0 = vld [vmem:[%s234_s1] sm:$0xff]   ;;  %138 = vmatprep.subr.bf16.mxu0 %v178_v1  ;;  %v152_v2 = vld [vmem:[%s234_s1 + $0x8] sm:$0xff]   ;;  %142 = vmatprep.mubr.msk.bf16.mxu0 %vm179_vm0, %v178_v1 }
   0x2   :  { %139 = vmatpush3.bf16.msra.mxu0 %v151_v0 }
   0x3   :  { %140 = vmatprep.subr.bf16.mxu0 %v178_v1 }
   0x4   :  { %8 = vsyncpa [#allocation4], 0  ;;  %21 = vst.msk [vmem:[#allocation2] sm:$0xff] %vm20_vm1, %v178_v1  ;;  %v153_v3 = vld [vmem:[%s233_s0] sm:$0xff]   ;;  %vm48_vm2 = vcmask 261120   ;;  %s180_s0 = smov [#allocation3]  }
   0x5   :  { %22 = vst.msk [vmem:[#allocation2 + $0x8] sm:$0xff] %vm20_vm1, %v178_v1  ;;  %v134_v12 = vld [vmem:[%s235_s2] ss:$0 sm:$0xff]  ;;  %s119_s19 = sshll.u32 %s180_s0, 4  ;;  %s120_s19 = int_to_ptr.vmem [resolvable:$true] %s119_s19 }
   0x6   :  { %141 = vmatpush3.bf16.msra.mxu0 %v152_v2  ;;  %s154_s20 = scalar_lea.vmem %s120_s19, 256  ;;  %p159_p1 = scmp.lt.s32.totalorder %s120_s19, %s120_s19 }
   0x7   :  { %p155_p0 = scmp.ne.s32.totalorder %s120_s19, %s154_s20  ;;  %p160_p2 = scmp.lt.s32.totalorder %s154_s20, %s154_s20 }
   0x9   :  { %143 = vmatmul.mubr.msk.bf16.vlgmr.msra.gmra.mrb[0].mxu0 %vm48_vm2, %v153_v3  ;;  %p161_p3 = por %p160_p2, %p159_p1 }
   0xb   :  { %v23_v4 = vld [vmem:[#allocation2] sm:$0xff]  ;;  %p162_p4 = pnand %p161_p3, %p155_p0 }
   0xc   :  { %v24_v6 = vld [vmem:[#allocation2 + $0x8] sm:$0xff] }
  0xdc   :  { %v86_v5 = vpop.f32.mrb[0].mxu0 }
  0xdd   :  { %v93_v7 = vadd.f32 %v86_v5, %v23_v4  ;;  %v144_v8 = vpop.f32.mrb[1].mxu0 }
  0xde   :  { %v89_v9 = vpop.f32.mrb[2].mxu0 }
  0xdf   :  { %96 = vst.msk [vmem:[#allocation2] sm:$0xff] %vm20_vm1, %v93_v7  ;;  %v94_v10 = vadd.f32 %v89_v9, %v24_v6  ;;  %v145_v11 = vpop.f32.mrb[3].mxu0 }
  0xe1   :  { %97 = vst.msk [vmem:[#allocation2 + $0x8] sm:$0xff] %vm20_vm1, %v94_v10 }
  0xe6   :  { %v101_v13 = vld [vmem:[#allocation2] sm:$0xff] }
  0xe7   :  { %v110_v14 = vadd.f32 %v134_v12, %v101_v13 }
  0xe8   :  { %v102_v15 = vld [vmem:[#allocation2 + $0x8] sm:$0xff] }
  0xe9   :  { %v111_v16 = vadd.f32 %v134_v12, %v102_v15  ;;  %112 = vst.msk [vmem:[#allocation3] sm:$0xff] %vm20_vm1, %v110_v14 }
  0xeb   :  { %113 = vst.msk [vmem:[#allocation3 + $0x8] sm:$0xff] %vm20_vm1, %v111_v16 }
  0xec   :  { %165 = shalt.err (!%p162_p4)
}
  0xed   :  { %s166_s22 = scalar_lea.hbm %s236_s3, 256 }
  0xee   :  { %p167_p5 = scmp.ne.s32.totalorder %s236_s3, %s166_s22  ;;  %p170_p6 = scmp.lt.u32.totalorder %s166_s22, %s236_s3 }
  0xf0   :  { %p172_p7 = pnand %p170_p6, %p167_p5 }
  0xf2   :  { %175 = shalt.err (!%p172_p7)
}
  0xf3   :  { %s181_s27 = smov 128   ;;  %s182_s28 = smov 8  }
  0xf4   :  { %125 = dma.vmem_to_hbm [thread:$0]  %s120_s19, 256, %s236_s3, [#allocation4], %s181_s27, %s181_s27, %s182_s28  }
  0xf5   :  { %176 = dma.done.wait [#allocation4], 256  }
  0xf6   :  { %177 = vsyncadd [#allocation4], 4294967040 }
  0xf7   :  { %129 = vsyncpa [#allocation4], 1 }

</bundles_post_ra>
